<compile_context>
chip_gen: v5e
topology: v5e:2x2
jax: 0.10.0
libtpu: 0.0.40
codegen_flags: <defaults>
</compile_context>

<pallas_src>
import functools

import jax
import jax.numpy as jnp
from jax.experimental import pallas as pl
from jax.experimental.pallas import tpu as pltpu


def _axis_cell_scan_kernel(xs_ref, h0_ref, wxg_ref, whg_ref, wht_ref, bg_ref,
                           hs_ref, h_scr):
    """One (b_blk, t_blk) tile of the rollout; h carried in VMEM scratch."""
    hidden = h0_ref.shape[-1]
    t_blk = xs_ref.shape[0]

    # New batch block starts: (re)load its initial hidden state.
    @pl.when(pl.program_id(1) == 0)
    def _():
        h_scr[...] = h0_ref[...]

    # VMEM-resident weights (constant index_map -> fetched from HBM once).
    wxg = wxg_ref[...]            # (F, 3H)  bf16   [r | z | trans] x-part
    whg = whg_ref[...]            # (H, 2H)  bf16   [r | z]         h-part
    wht = wht_ref[...]            # (H, H)   bf16   trans (r*h)-part
    bg = bg_ref[...]              # (1, 3H)  f32    [b_r | b_z | b_t]

    h = h_scr[...]                # (b_blk, H) f32 carried state

    # Static Python loop -> fully unrolled; the x-dependent MXU pushes of all
    # steps are independent of the recurrence and can be scheduled early.
    for t in range(t_blk):
        x_t = xs_ref[t].astype(jnp.bfloat16)                    # (b_blk, F)
        gx = jnp.dot(x_t, wxg,
                     preferred_element_type=jnp.float32) + bg   # (b_blk, 3H)
        gh = jnp.dot(h.astype(jnp.bfloat16), whg,
                     preferred_element_type=jnp.float32)        # (b_blk, 2H)
        gates = jax.nn.sigmoid(gx[:, :2 * hidden] + gh)         # EUP
        r = gates[:, :hidden]
        z = gates[:, hidden:]
        pre_t = gx[:, 2 * hidden:] + jnp.dot(
            (r * h).astype(jnp.bfloat16), wht,
            preferred_element_type=jnp.float32)                 # (b_blk, H)
        h = (1.0 - z) * h + z * jnp.tanh(pre_t)                 # EUP + VPU blend
        hs_ref[t] = h                                           # slab store

    h_scr[...] = h                # carry across time (grid axis 1) blocks


def prepare_axis_cell_params(w1, b1, w2, b2, feature_dim,
                             weight_dtype=jnp.bfloat16):
    """One-time conversion of PyTorch-layout params into fused MXU-ready layout.

    w1: (2H, F+H), b1: (2H,), w2: (H, F+H), b2: (H,)   (PyTorch (out, in)).
    Run once at parameter-setup time, NOT per call.
    """
    w1 = jnp.asarray(w1, jnp.float32)
    w2 = jnp.asarray(w2, jnp.float32)
    b1 = jnp.asarray(b1, jnp.float32)
    b2 = jnp.asarray(b2, jnp.float32)
    hidden = w2.shape[0]

    w1x, w1h = w1[:, :feature_dim], w1[:, feature_dim:]     # (2H,F), (2H,H)
    w2x, w2h = w2[:, :feature_dim], w2[:, feature_dim:]     # (H,F),  (H,H)

    return {
        # x contributions to [r | z | trans]: one fused (F, 3H) matmul.
        "wx_g": jnp.concatenate(
            [w1x[:hidden].T, w1x[hidden:].T, w2x.T], axis=1).astype(weight_dtype),
        # h contributions to [r | z]: one fused (H, 2H) matmul.
        "wh_g": jnp.concatenate(
            [w1h[:hidden].T, w1h[hidden:].T], axis=1).astype(weight_dtype),
        # (r*h) contribution to trans: the only matmul on the serial chain.
        "wh_t": w2h.T.astype(weight_dtype),
        # Fused biases [b_r | b_z | b_t], kept in f32.
        "b_g": jnp.concatenate([b1, b2]).reshape(1, 3 * hidden),
    }


@functools.partial(jax.jit, static_argnames=("t_blk", "b_blk"))
def axis_cell_scan(xs, h0, params, *, t_blk=8, b_blk=8):
    """Batched T-step AxisCell rollout in a single pallas_call.

    xs: (T, B, F), h0: (B, H).  Returns hs: (T, B, H) (hs[-1] = final state).
    """
    T, B, F = xs.shape
    H = h0.shape[-1]
    assert T % t_blk == 0 and B % b_blk == 0, (T, B, t_blk, b_blk)

    xs = xs.astype(jnp.float32)
    h0 = h0.astype(jnp.float32)
    wx_g, wh_g, wh_t, b_g = (params["wx_g"], params["wh_g"],
                             params["wh_t"], params["b_g"])

    def const_spec(a):  # whole array, same block every grid step -> resident
        return pl.BlockSpec(a.shape, lambda b, t: (0,) * a.ndim)

    weight_bytes = sum(int(p.size) * p.dtype.itemsize
                       for p in (wx_g, wh_g, wh_t, b_g))
    cost = pl.CostEstimate(
        flops=int(2 * T * B * (F * 3 * H + 2 * H * H + H * H) + 12 * T * B * H),
        transcendentals=int(3 * T * B * H),
        bytes_accessed=int(4 * (xs.size + h0.size + T * B * H) + weight_bytes),
    )

    return pl.pallas_call(
        _axis_cell_scan_kernel,
        out_shape=jax.ShapeDtypeStruct((T, B, H), jnp.float32),
        grid=(B // b_blk, T // t_blk),
        in_specs=[
            pl.BlockSpec((t_blk, b_blk, F), lambda b, t: (t, b, 0)),  # x chunks
            pl.BlockSpec((b_blk, H), lambda b, t: (b, 0)),            # h0
            const_spec(wx_g), const_spec(wh_g),                       # resident
            const_spec(wh_t), const_spec(b_g),                        # weights
        ],
        out_specs=pl.BlockSpec((t_blk, b_blk, H), lambda b, t: (t, b, 0)),
        scratch_shapes=[pltpu.VMEM((b_blk, H), jnp.float32)],         # carried h
        compiler_params=pltpu.CompilerParams(
            # Batch axis shards across v7x's two TensorCores; time carries h.
            dimension_semantics=("parallel", "arbitrary"),
            vmem_limit_bytes=32 * 1024 * 1024,
        ),
        cost_estimate=cost,
    )(xs, h0, wx_g, wh_g, wh_t, b_g)


def axis_cell(x, h, params):
    """Single-step forward matching AxisCell.forward (1-D x and h).

    Convenience path; for rollouts use axis_cell_scan (one launch, resident
    weights) instead of calling this per step.
    """
    # TODO(synk): if an external driver insists on per-step calls, add a
    # dedicated single-step pallas_call with input_output_aliases so next_h
    # overwrites the h buffer in place.
    hs = axis_cell_scan(x.reshape(1, 1, -1), h.reshape(1, -1), params,
                        t_blk=1, b_blk=1)
    return hs.reshape(h.shape[-1])


# ----------------------------- references ----------------------------------

def _axis_cell_ref_step(x, h, w1, b1, w2, b2):
    """Original f32 PyTorch semantics (works for 1-D or batched inputs)."""
    hidden = h.shape[-1]
    xh = jnp.concatenate([x, h], axis=-1)
    activated = jax.nn.sigmoid(xh @ w1.T + b1)
    r = activated[..., :hidden]
    z = activated[..., hidden:]
    trans = jnp.tanh(jnp.concatenate([x, r * h], axis=-1) @ w2.T + b2)
    return (1.0 - z) * h + z * trans


def _axis_cell_ref_scan(xs, h0, w1, b1, w2, b2):
    def step(h, x):
        h_next = _axis_cell_ref_step(x, h, w1, b1, w2, b2)
        return h_next, h_next
    _, hs = jax.lax.scan(step, h0, xs)
    return hs


def _kernel_math_ref_scan(xs, h0, params):
    """Pure-JAX replica of the kernel math (same bf16 weights / casts)."""
    hidden = h0.shape[-1]
    wxg, whg, wht, bg = (params["wx_g"], params["wh_g"],
                         params["wh_t"], params["b_g"])

    def step(h, x):
        gx = jnp.dot(x.astype(jnp.bfloat16), wxg,
                     preferred_element_type=jnp.float32) + bg
        gh = jnp.dot(h.astype(jnp.bfloat16), whg,
                     preferred_element_type=jnp.float32)
        gates = jax.nn.sigmoid(gx[:, :2 * hidden] + gh)
        r = gates[:, :hidden]
        z = gates[:, hidden:]
        pre_t = gx[:, 2 * hidden:] + jnp.dot(
            (r * h).astype(jnp.bfloat16), wht,
            preferred_element_type=jnp.float32)
        h = (1.0 - z) * h + z * jnp.tanh(pre_t)
        return h, h

    _, hs = jax.lax.scan(step, h0.astype(jnp.float32), xs.astype(jnp.float32))
    return hs


if __name__ == "__main__":
    FEATURE_DIM, HIDDEN = 64, 32
    T, B = 16, 16

    key = jax.random.PRNGKey(0)
    k = jax.random.split(key, 6)

    # Deterministic PyTorch-Linear-style init: U(-1/sqrt(in), 1/sqrt(in)).
    fan_in = FEATURE_DIM + HIDDEN
    bound = fan_in ** -0.5
    w1 = jax.random.uniform(k[0], (2 * HIDDEN, fan_in), jnp.float32, -bound, bound)
    b1 = jax.random.uniform(k[1], (2 * HIDDEN,), jnp.float32, -bound, bound)
    w2 = jax.random.uniform(k[2], (HIDDEN, fan_in), jnp.float32, -bound, bound)
    b2 = jax.random.uniform(k[3], (HIDDEN,), jnp.float32, -bound, bound)

    xs = jax.random.normal(k[4], (T, B, FEATURE_DIM), jnp.float32)
    h0 = jax.random.normal(k[5], (B, HIDDEN), jnp.float32)

    # One-time weight preparation (outside the per-call hot path).
    params = prepare_axis_cell_params(w1, b1, w2, b2, FEATURE_DIM)
    params = jax.tree_util.tree_map(jax.block_until_ready, params)

    # Batched T-step rollout: one pallas_call, weights VMEM-resident.
    hs = axis_cell_scan(xs, h0, params, t_blk=8, b_blk=8)
    jax.block_until_ready(hs)
    assert hs.shape == (T, B, HIDDEN)

    # (a) Kernel math is exact vs. a pure-JAX replica using the same bf16
    #     weights and casts (tight tolerance).
    hs_same_math = _kernel_math_ref_scan(xs, h0, params)
    assert jnp.allclose(hs, hs_same_math, atol=5e-3, rtol=5e-3), (
        "kernel disagrees with same-precision reference")

    # (b) Fidelity to the original f32 PyTorch semantics (loose tolerance:
    #     documents only the bf16 weight quantization).
    hs_f32 = _axis_cell_ref_scan(xs, h0, w1, b1, w2, b2)
    assert jnp.allclose(hs, hs_f32, atol=5e-2, rtol=5e-2), (
        "kernel drifted from f32 reference semantics")

    # (c) Single-step interface == AxisCell.forward on 1-D x / h.
    x1, h1 = xs[0, 0], h0[0]
    next_h = axis_cell(x1, h1, params)
    jax.block_until_ready(next_h)
    ref1 = _axis_cell_ref_step(x1, h1, w1, b1, w2, b2)
    assert next_h.shape == (HIDDEN,)
    assert jnp.allclose(next_h, ref1, atol=2e-2, rtol=2e-2), (
        "single-step output mismatch vs reference")

    print("KERNEL_OK")
</pallas_src>

<mosaic_0001>
module attributes {stable_mosaic.version = 11 : i64} {
  func.func @_axis_cell_scan_kernel(%arg0: i32, %arg1: i32, %arg2: memref<8x8x64xf32, #tpu.memory_space<vmem>>, %arg3: memref<8x32xf32, #tpu.memory_space<vmem>>, %arg4: memref<64x96xbf16, #tpu.memory_space<vmem>>, %arg5: memref<32x64xbf16, #tpu.memory_space<vmem>>, %arg6: memref<32x32xbf16, #tpu.memory_space<vmem>>, %arg7: memref<1x96xf32, #tpu.memory_space<vmem>>, %arg8: memref<8x8x32xf32, #tpu.memory_space<vmem>>, %arg9: memref<8x32xf32, #tpu.memory_space<vmem>>) attributes {dimension_semantics = [#tpu.dimension_semantics<parallel>, #tpu.dimension_semantics<arbitrary>], iteration_bounds = array<i64: 2, 2>, scalar_prefetch = 0 : i64, scratch_operands = 1 : i64, tpu.core_type = #tpu.core_type<tc>, window_params = [{transform_indices = @transform_0, window_bounds = array<i64: 8, 8, 64>}, {transform_indices = @transform_1, window_bounds = array<i64: 8, 32>}, {pipeline_mode = #tpu.pipeline_mode<synchronous>, transform_indices = @transform_2, window_bounds = array<i64: 64, 96>}, {pipeline_mode = #tpu.pipeline_mode<synchronous>, transform_indices = @transform_3, window_bounds = array<i64: 32, 64>}, {pipeline_mode = #tpu.pipeline_mode<synchronous>, transform_indices = @transform_4, window_bounds = array<i64: 32, 32>}, {pipeline_mode = #tpu.pipeline_mode<synchronous>, transform_indices = @transform_5, window_bounds = array<i64: 1, 96>}, {transform_indices = @transform_6, window_bounds = array<i64: 8, 8, 32>}]} {
    %c0_i32 = arith.constant 0 : i32
    %0 = arith.cmpi eq, %arg1, %c0_i32 : i32
    %1 = arith.extui %0 : i1 to i32
    %c0_i32_0 = arith.constant 0 : i32
    %2 = arith.cmpi ne, %1, %c0_i32_0 : i32
    scf.if %2 {
      %c0_92 = arith.constant 0 : index
      %c0_93 = arith.constant 0 : index
      %257 = vector.load %arg3[%c0_92, %c0_93] : memref<8x32xf32, #tpu.memory_space<vmem>>, vector<8x32xf32>
      %c0_94 = arith.constant 0 : index
      %c0_95 = arith.constant 0 : index
      %258 = vector.load %arg9[%c0_94, %c0_95] : memref<8x32xf32, #tpu.memory_space<vmem>>, vector<8x32xf32>
      tpu.vector_store %arg9[%c0_94, %c0_95], %257 {strides = array<i32>} : memref<8x32xf32, #tpu.memory_space<vmem>>, vector<8x32xf32>,
    } else {
    }
    %c0 = arith.constant 0 : index
    %c0_1 = arith.constant 0 : index
    %3 = vector.load %arg4[%c0, %c0_1] : memref<64x96xbf16, #tpu.memory_space<vmem>>, vector<64x96xbf16>
    %c0_2 = arith.constant 0 : index
    %c0_3 = arith.constant 0 : index
    %4 = vector.load %arg5[%c0_2, %c0_3] : memref<32x64xbf16, #tpu.memory_space<vmem>>, vector<32x64xbf16>
    %c0_4 = arith.constant 0 : index
    %c0_5 = arith.constant 0 : index
    %5 = vector.load %arg6[%c0_4, %c0_5] : memref<32x32xbf16, #tpu.memory_space<vmem>>, vector<32x32xbf16>
    %c0_6 = arith.constant 0 : index
    %c0_7 = arith.constant 0 : index
    %6 = vector.load %arg7[%c0_6, %c0_7] : memref<1x96xf32, #tpu.memory_space<vmem>>, vector<1x96xf32>
    %c0_8 = arith.constant 0 : index
    %c0_9 = arith.constant 0 : index
    %7 = vector.load %arg9[%c0_8, %c0_9] : memref<8x32xf32, #tpu.memory_space<vmem>>, vector<8x32xf32>
    %c0_10 = arith.constant 0 : index
    %c0_11 = arith.constant 0 : index
    %c0_12 = arith.constant 0 : index
    %8 = vector.load %arg2[%c0_10, %c0_11, %c0_12] : memref<8x8x64xf32, #tpu.memory_space<vmem>>, vector<1x8x64xf32>
    %9 = vector.shape_cast %8 : vector<1x8x64xf32> to vector<8x64xf32>
    %10 = arith.truncf %9 : vector<8x64xf32> to vector<8x64xbf16>
    %cst = arith.constant dense<0.000000e+00> : vector<8x96xf32>
    %11 = tpu.matmul %10, %3, %cst {dimension_numbers = #tpu.dot_dimension_numbers<[1], [0], [0], [1], [0, 0, 1, 1], [], []>} : vector<8x64xbf16>, vector<64x96xbf16>, vector<8x96xf32> -> vector<8x96xf32>
    %12 = vector.broadcast %6 : vector<1x96xf32> to vector<8x96xf32>
    %13 = arith.addf %11, %12 : vector<8x96xf32>
    %14 = arith.truncf %7 : vector<8x32xf32> to vector<8x32xbf16>
    %cst_13 = arith.constant dense<0.000000e+00> : vector<8x64xf32>
    %15 = tpu.matmul %14, %4, %cst_13 {dimension_numbers = #tpu.dot_dimension_numbers<[1], [0], [0], [1], [0, 0, 1, 1], [], []>} : vector<8x32xbf16>, vector<32x64xbf16>, vector<8x64xf32> -> vector<8x64xf32>
    %16 = vector.extract_strided_slice %13 {offsets = [0, 0], sizes = [8, 64], strides = [1, 1]} : vector<8x96xf32> to vector<8x64xf32>
    %17 = arith.addf %16, %15 : vector<8x64xf32>
    %18 = arith.negf %17 : vector<8x64xf32>
    %19 = math.exp %18 : vector<8x64xf32>
    %cst_14 = arith.constant 1.000000e+00 : f32
    %20 = vector.broadcast %cst_14 : f32 to vector<8x64xf32>
    %21 = arith.addf %20, %19 : vector<8x64xf32>
    %22 = arith.divf %20, %21 : vector<8x64xf32>
    %23 = vector.extract_strided_slice %22 {offsets = [0, 0], sizes = [8, 32], strides = [1, 1]} : vector<8x64xf32> to vector<8x32xf32>
    %24 = vector.extract_strided_slice %22 {offsets = [0, 32], sizes = [8, 32], strides = [1, 1]} : vector<8x64xf32> to vector<8x32xf32>
    %25 = vector.extract_strided_slice %13 {offsets = [0, 64], sizes = [8, 32], strides = [1, 1]} : vector<8x96xf32> to vector<8x32xf32>
    %26 = arith.mulf %23, %7 : vector<8x32xf32>
    %27 = arith.truncf %26 : vector<8x32xf32> to vector<8x32xbf16>
    %cst_15 = arith.constant dense<0.000000e+00> : vector<8x32xf32>
    %28 = tpu.matmul %27, %5, %cst_15 {dimension_numbers = #tpu.dot_dimension_numbers<[1], [0], [0], [1], [0, 0, 1, 1], [], []>} : vector<8x32xbf16>, vector<32x32xbf16>, vector<8x32xf32> -> vector<8x32xf32>
    %29 = arith.addf %25, %28 : vector<8x32xf32>
    %cst_16 = arith.constant 1.000000e+00 : f32
    %30 = vector.broadcast %cst_16 : f32 to vector<8x32xf32>
    %31 = arith.subf %30, %24 : vector<8x32xf32>
    %32 = arith.mulf %31, %7 : vector<8x32xf32>
    %33 = math.tanh %29 : vector<8x32xf32>
    %34 = arith.mulf %24, %33 : vector<8x32xf32>
    %35 = arith.addf %32, %34 : vector<8x32xf32>
    %c0_17 = arith.constant 0 : index
    %c0_18 = arith.constant 0 : index
    %c0_19 = arith.constant 0 : index
    %36 = vector.load %arg8[%c0_17, %c0_18, %c0_19] : memref<8x8x32xf32, #tpu.memory_space<vmem>>, vector<1x8x32xf32>
    %37 = vector.shape_cast %36 : vector<1x8x32xf32> to vector<8x32xf32>
    %38 = vector.shape_cast %35 : vector<8x32xf32> to vector<1x8x32xf32>
    tpu.vector_store %arg8[%c0_17, %c0_18, %c0_19], %38 {strides = array<i32>} : memref<8x8x32xf32, #tpu.memory_space<vmem>>, vector<1x8x32xf32>,
    %c1 = arith.constant 1 : index
    %c0_20 = arith.constant 0 : index
    %c0_21 = arith.constant 0 : index
    %39 = vector.load %arg2[%c1, %c0_20, %c0_21] : memref<8x8x64xf32, #tpu.memory_space<vmem>>, vector<1x8x64xf32>
    %40 = vector.shape_cast %39 : vector<1x8x64xf32> to vector<8x64xf32>
    %41 = arith.truncf %40 : vector<8x64xf32> to vector<8x64xbf16>
    %cst_22 = arith.constant dense<0.000000e+00> : vector<8x96xf32>
    %42 = tpu.matmul %41, %3, %cst_22 {dimension_numbers = #tpu.dot_dimension_numbers<[1], [0], [0], [1], [0, 0, 1, 1], [], []>} : vector<8x64xbf16>, vector<64x96xbf16>, vector<8x96xf32> -> vector<8x96xf32>
    %43 = vector.broadcast %6 : vector<1x96xf32> to vector<8x96xf32>
    %44 = arith.addf %42, %43 : vector<8x96xf32>
    %45 = arith.truncf %35 : vector<8x32xf32> to vector<8x32xbf16>
    %cst_23 = arith.constant dense<0.000000e+00> : vector<8x64xf32>
    %46 = tpu.matmul %45, %4, %cst_23 {dimension_numbers = #tpu.dot_dimension_numbers<[1], [0], [0], [1], [0, 0, 1, 1], [], []>} : vector<8x32xbf16>, vector<32x64xbf16>, vector<8x64xf32> -> vector<8x64xf32>
    %47 = vector.extract_strided_slice %44 {offsets = [0, 0], sizes = [8, 64], strides = [1, 1]} : vector<8x96xf32> to vector<8x64xf32>
    %48 = arith.addf %47, %46 : vector<8x64xf32>
    %49 = arith.negf %48 : vector<8x64xf32>
    %50 = math.exp %49 : vector<8x64xf32>
    %cst_24 = arith.constant 1.000000e+00 : f32
    %51 = vector.broadcast %cst_24 : f32 to vector<8x64xf32>
    %52 = arith.addf %51, %50 : vector<8x64xf32>
    %53 = arith.divf %51, %52 : vector<8x64xf32>
    %54 = vector.extract_strided_slice %53 {offsets = [0, 0], sizes = [8, 32], strides = [1, 1]} : vector<8x64xf32> to vector<8x32xf32>
    %55 = vector.extract_strided_slice %53 {offsets = [0, 32], sizes = [8, 32], strides = [1, 1]} : vector<8x64xf32> to vector<8x32xf32>
    %56 = vector.extract_strided_slice %44 {offsets = [0, 64], sizes = [8, 32], strides = [1, 1]} : vector<8x96xf32> to vector<8x32xf32>
    %57 = arith.mulf %54, %35 : vector<8x32xf32>
    %58 = arith.truncf %57 : vector<8x32xf32> to vector<8x32xbf16>
    %cst_25 = arith.constant dense<0.000000e+00> : vector<8x32xf32>
    %59 = tpu.matmul %58, %5, %cst_25 {dimension_numbers = #tpu.dot_dimension_numbers<[1], [0], [0], [1], [0, 0, 1, 1], [], []>} : vector<8x32xbf16>, vector<32x32xbf16>, vector<8x32xf32> -> vector<8x32xf32>
    %60 = arith.addf %56, %59 : vector<8x32xf32>
    %cst_26 = arith.constant 1.000000e+00 : f32
    %61 = vector.broadcast %cst_26 : f32 to vector<8x32xf32>
    %62 = arith.subf %61, %55 : vector<8x32xf32>
    %63 = arith.mulf %62, %35 : vector<8x32xf32>
    %64 = math.tanh %60 : vector<8x32xf32>
    %65 = arith.mulf %55, %64 : vector<8x32xf32>
    %66 = arith.addf %63, %65 : vector<8x32xf32>
    %c1_27 = arith.constant 1 : index
    %c0_28 = arith.constant 0 : index
    %c0_29 = arith.constant 0 : index
    %67 = vector.load %arg8[%c1_27, %c0_28, %c0_29] : memref<8x8x32xf32, #tpu.memory_space<vmem>>, vector<1x8x32xf32>
    %68 = vector.shape_cast %67 : vector<1x8x32xf32> to vector<8x32xf32>
    %69 = vector.shape_cast %66 : vector<8x32xf32> to vector<1x8x32xf32>
    tpu.vector_store %arg8[%c1_27, %c0_28, %c0_29], %69 {strides = array<i32>} : memref<8x8x32xf32, #tpu.memory_space<vmem>>, vector<1x8x32xf32>,
    %c2 = arith.constant 2 : index
    %c0_30 = arith.constant 0 : index
    %c0_31 = arith.constant 0 : index
    %70 = vector.load %arg2[%c2, %c0_30, %c0_31] : memref<8x8x64xf32, #tpu.memory_space<vmem>>, vector<1x8x64xf32>
    %71 = vector.shape_cast %70 : vector<1x8x64xf32> to vector<8x64xf32>
    %72 = arith.truncf %71 : vector<8x64xf32> to vector<8x64xbf16>
    %cst_32 = arith.constant dense<0.000000e+00> : vector<8x96xf32>
    %73 = tpu.matmul %72, %3, %cst_32 {dimension_numbers = #tpu.dot_dimension_numbers<[1], [0], [0], [1], [0, 0, 1, 1], [], []>} : vector<8x64xbf16>, vector<64x96xbf16>, vector<8x96xf32> -> vector<8x96xf32>
    %74 = vector.broadcast %6 : vector<1x96xf32> to vector<8x96xf32>
    %75 = arith.addf %73, %74 : vector<8x96xf32>
    %76 = arith.truncf %66 : vector<8x32xf32> to vector<8x32xbf16>
    %cst_33 = arith.constant dense<0.000000e+00> : vector<8x64xf32>
    %77 = tpu.matmul %76, %4, %cst_33 {dimension_numbers = #tpu.dot_dimension_numbers<[1], [0], [0], [1], [0, 0, 1, 1], [], []>} : vector<8x32xbf16>, vector<32x64xbf16>, vector<8x64xf32> -> vector<8x64xf32>
    %78 = vector.extract_strided_slice %75 {offsets = [0, 0], sizes = [8, 64], strides = [1, 1]} : vector<8x96xf32> to vector<8x64xf32>
    %79 = arith.addf %78, %77 : vector<8x64xf32>
    %80 = arith.negf %79 : vector<8x64xf32>
    %81 = math.exp %80 : vector<8x64xf32>
    %cst_34 = arith.constant 1.000000e+00 : f32
    %82 = vector.broadcast %cst_34 : f32 to vector<8x64xf32>
    %83 = arith.addf %82, %81 : vector<8x64xf32>
    %84 = arith.divf %82, %83 : vector<8x64xf32>
    %85 = vector.extract_strided_slice %84 {offsets = [0, 0], sizes = [8, 32], strides = [1, 1]} : vector<8x64xf32> to vector<8x32xf32>
    %86 = vector.extract_strided_slice %84 {offsets = [0, 32], sizes = [8, 32], strides = [1, 1]} : vector<8x64xf32> to vector<8x32xf32>
    %87 = vector.extract_strided_slice %75 {offsets = [0, 64], sizes = [8, 32], strides = [1, 1]} : vector<8x96xf32> to vector<8x32xf32>
    %88 = arith.mulf %85, %66 : vector<8x32xf32>
    %89 = arith.truncf %88 : vector<8x32xf32> to vector<8x32xbf16>
    %cst_35 = arith.constant dense<0.000000e+00> : vector<8x32xf32>
    %90 = tpu.matmul %89, %5, %cst_35 {dimension_numbers = #tpu.dot_dimension_numbers<[1], [0], [0], [1], [0, 0, 1, 1], [], []>} : vector<8x32xbf16>, vector<32x32xbf16>, vector<8x32xf32> -> vector<8x32xf32>
    %91 = arith.addf %87, %90 : vector<8x32xf32>
    %cst_36 = arith.constant 1.000000e+00 : f32
    %92 = vector.broadcast %cst_36 : f32 to vector<8x32xf32>
    %93 = arith.subf %92, %86 : vector<8x32xf32>
    %94 = arith.mulf %93, %66 : vector<8x32xf32>
    %95 = math.tanh %91 : vector<8x32xf32>
    %96 = arith.mulf %86, %95 : vector<8x32xf32>
    %97 = arith.addf %94, %96 : vector<8x32xf32>
    %c2_37 = arith.constant 2 : index
    %c0_38 = arith.constant 0 : index
    %c0_39 = arith.constant 0 : index
    %98 = vector.load %arg8[%c2_37, %c0_38, %c0_39] : memref<8x8x32xf32, #tpu.memory_space<vmem>>, vector<1x8x32xf32>
    %99 = vector.shape_cast %98 : vector<1x8x32xf32> to vector<8x32xf32>
    %100 = vector.shape_cast %97 : vector<8x32xf32> to vector<1x8x32xf32>
    tpu.vector_store %arg8[%c2_37, %c0_38, %c0_39], %100 {strides = array<i32>} : memref<8x8x32xf32, #tpu.memory_space<vmem>>, vector<1x8x32xf32>,
    %c3 = arith.constant 3 : index
    %c0_40 = arith.constant 0 : index
    %c0_41 = arith.constant 0 : index
    %101 = vector.load %arg2[%c3, %c0_40, %c0_41] : memref<8x8x64xf32, #tpu.memory_space<vmem>>, vector<1x8x64xf32>
    %102 = vector.shape_cast %101 : vector<1x8x64xf32> to vector<8x64xf32>
    %103 = arith.truncf %102 : vector<8x64xf32> to vector<8x64xbf16>
    %cst_42 = arith.constant dense<0.000000e+00> : vector<8x96xf32>
    %104 = tpu.matmul %103, %3, %cst_42 {dimension_numbers = #tpu.dot_dimension_numbers<[1], [0], [0], [1], [0, 0, 1, 1], [], []>} : vector<8x64xbf16>, vector<64x96xbf16>, vector<8x96xf32> -> vector<8x96xf32>
    %105 = vector.broadcast %6 : vector<1x96xf32> to vector<8x96xf32>
    %106 = arith.addf %104, %105 : vector<8x96xf32>
    %107 = arith.truncf %97 : vector<8x32xf32> to vector<8x32xbf16>
    %cst_43 = arith.constant dense<0.000000e+00> : vector<8x64xf32>
    %108 = tpu.matmul %107, %4, %cst_43 {dimension_numbers = #tpu.dot_dimension_numbers<[1], [0], [0], [1], [0, 0, 1, 1], [], []>} : vector<8x32xbf16>, vector<32x64xbf16>, vector<8x64xf32> -> vector<8x64xf32>
    %109 = vector.extract_strided_slice %106 {offsets = [0, 0], sizes = [8, 64], strides = [1, 1]} : vector<8x96xf32> to vector<8x64xf32>
    %110 = arith.addf %109, %108 : vector<8x64xf32>
    %111 = arith.negf %110 : vector<8x64xf32>
    %112 = math.exp %111 : vector<8x64xf32>
    %cst_44 = arith.constant 1.000000e+00 : f32
    %113 = vector.broadcast %cst_44 : f32 to vector<8x64xf32>
    %114 = arith.addf %113, %112 : vector<8x64xf32>
    %115 = arith.divf %113, %114 : vector<8x64xf32>
    %116 = vector.extract_strided_slice %115 {offsets = [0, 0], sizes = [8, 32], strides = [1, 1]} : vector<8x64xf32> to vector<8x32xf32>
    %117 = vector.extract_strided_slice %115 {offsets = [0, 32], sizes = [8, 32], strides = [1, 1]} : vector<8x64xf32> to vector<8x32xf32>
    %118 = vector.extract_strided_slice %106 {offsets = [0, 64], sizes = [8, 32], strides = [1, 1]} : vector<8x96xf32> to vector<8x32xf32>
    %119 = arith.mulf %116, %97 : vector<8x32xf32>
    %120 = arith.truncf %119 : vector<8x32xf32> to vector<8x32xbf16>
    %cst_45 = arith.constant dense<0.000000e+00> : vector<8x32xf32>
    %121 = tpu.matmul %120, %5, %cst_45 {dimension_numbers = #tpu.dot_dimension_numbers<[1], [0], [0], [1], [0, 0, 1, 1], [], []>} : vector<8x32xbf16>, vector<32x32xbf16>, vector<8x32xf32> -> vector<8x32xf32>
    %122 = arith.addf %118, %121 : vector<8x32xf32>
    %cst_46 = arith.constant 1.000000e+00 : f32
    %123 = vector.broadcast %cst_46 : f32 to vector<8x32xf32>
    %124 = arith.subf %123, %117 : vector<8x32xf32>
    %125 = arith.mulf %124, %97 : vector<8x32xf32>
    %126 = math.tanh %122 : vector<8x32xf32>
    %127 = arith.mulf %117, %126 : vector<8x32xf32>
    %128 = arith.addf %125, %127 : vector<8x32xf32>
    %c3_47 = arith.constant 3 : index
    %c0_48 = arith.constant 0 : index
    %c0_49 = arith.constant 0 : index
    %129 = vector.load %arg8[%c3_47, %c0_48, %c0_49] : memref<8x8x32xf32, #tpu.memory_space<vmem>>, vector<1x8x32xf32>
    %130 = vector.shape_cast %129 : vector<1x8x32xf32> to vector<8x32xf32>
    %131 = vector.shape_cast %128 : vector<8x32xf32> to vector<1x8x32xf32>
    tpu.vector_store %arg8[%c3_47, %c0_48, %c0_49], %131 {strides = array<i32>} : memref<8x8x32xf32, #tpu.memory_space<vmem>>, vector<1x8x32xf32>,
    %c4 = arith.constant 4 : index
    %c0_50 = arith.constant 0 : index
    %c0_51 = arith.constant 0 : index
    %132 = vector.load %arg2[%c4, %c0_50, %c0_51] : memref<8x8x64xf32, #tpu.memory_space<vmem>>, vector<1x8x64xf32>
    %133 = vector.shape_cast %132 : vector<1x8x64xf32> to vector<8x64xf32>
    %134 = arith.truncf %133 : vector<8x64xf32> to vector<8x64xbf16>
    %cst_52 = arith.constant dense<0.000000e+00> : vector<8x96xf32>
    %135 = tpu.matmul %134, %3, %cst_52 {dimension_numbers = #tpu.dot_dimension_numbers<[1], [0], [0], [1], [0, 0, 1, 1], [], []>} : vector<8x64xbf16>, vector<64x96xbf16>, vector<8x96xf32> -> vector<8x96xf32>
    %136 = vector.broadcast %6 : vector<1x96xf32> to vector<8x96xf32>
    %137 = arith.addf %135, %136 : vector<8x96xf32>
    %138 = arith.truncf %128 : vector<8x32xf32> to vector<8x32xbf16>
    %cst_53 = arith.constant dense<0.000000e+00> : vector<8x64xf32>
    %139 = tpu.matmul %138, %4, %cst_53 {dimension_numbers = #tpu.dot_dimension_numbers<[1], [0], [0], [1], [0, 0, 1, 1], [], []>} : vector<8x32xbf16>, vector<32x64xbf16>, vector<8x64xf32> -> vector<8x64xf32>
    %140 = vector.extract_strided_slice %137 {offsets = [0, 0], sizes = [8, 64], strides = [1, 1]} : vector<8x96xf32> to vector<8x64xf32>
    %141 = arith.addf %140, %139 : vector<8x64xf32>
    %142 = arith.negf %141 : vector<8x64xf32>
    %143 = math.exp %142 : vector<8x64xf32>
    %cst_54 = arith.constant 1.000000e+00 : f32
    %144 = vector.broadcast %cst_54 : f32 to vector<8x64xf32>
    %145 = arith.addf %144, %143 : vector<8x64xf32>
    %146 = arith.divf %144, %145 : vector<8x64xf32>
    %147 = vector.extract_strided_slice %146 {offsets = [0, 0], sizes = [8, 32], strides = [1, 1]} : vector<8x64xf32> to vector<8x32xf32>
    %148 = vector.extract_strided_slice %146 {offsets = [0, 32], sizes = [8, 32], strides = [1, 1]} : vector<8x64xf32> to vector<8x32xf32>
    %149 = vector.extract_strided_slice %137 {offsets = [0, 64], sizes = [8, 32], strides = [1, 1]} : vector<8x96xf32> to vector<8x32xf32>
    %150 = arith.mulf %147, %128 : vector<8x32xf32>
    %151 = arith.truncf %150 : vector<8x32xf32> to vector<8x32xbf16>
    %cst_55 = arith.constant dense<0.000000e+00> : vector<8x32xf32>
    %152 = tpu.matmul %151, %5, %cst_55 {dimension_numbers = #tpu.dot_dimension_numbers<[1], [0], [0], [1], [0, 0, 1, 1], [], []>} : vector<8x32xbf16>, vector<32x32xbf16>, vector<8x32xf32> -> vector<8x32xf32>
    %153 = arith.addf %149, %152 : vector<8x32xf32>
    %cst_56 = arith.constant 1.000000e+00 : f32
    %154 = vector.broadcast %cst_56 : f32 to vector<8x32xf32>
    %155 = arith.subf %154, %148 : vector<8x32xf32>
    %156 = arith.mulf %155, %128 : vector<8x32xf32>
    %157 = math.tanh %153 : vector<8x32xf32>
    %158 = arith.mulf %148, %157 : vector<8x32xf32>
    %159 = arith.addf %156, %158 : vector<8x32xf32>
    %c4_57 = arith.constant 4 : index
    %c0_58 = arith.constant 0 : index
    %c0_59 = arith.constant 0 : index
    %160 = vector.load %arg8[%c4_57, %c0_58, %c0_59] : memref<8x8x32xf32, #tpu.memory_space<vmem>>, vector<1x8x32xf32>
    %161 = vector.shape_cast %160 : vector<1x8x32xf32> to vector<8x32xf32>
    %162 = vector.shape_cast %159 : vector<8x32xf32> to vector<1x8x32xf32>
    tpu.vector_store %arg8[%c4_57, %c0_58, %c0_59], %162 {strides = array<i32>} : memref<8x8x32xf32, #tpu.memory_space<vmem>>, vector<1x8x32xf32>,
    %c5 = arith.constant 5 : index
    %c0_60 = arith.constant 0 : index
    %c0_61 = arith.constant 0 : index
    %163 = vector.load %arg2[%c5, %c0_60, %c0_61] : memref<8x8x64xf32, #tpu.memory_space<vmem>>, vector<1x8x64xf32>
    %164 = vector.shape_cast %163 : vector<1x8x64xf32> to vector<8x64xf32>
    %165 = arith.truncf %164 : vector<8x64xf32> to vector<8x64xbf16>
    %cst_62 = arith.constant dense<0.000000e+00> : vector<8x96xf32>
    %166 = tpu.matmul %165, %3, %cst_62 {dimension_numbers = #tpu.dot_dimension_numbers<[1], [0], [0], [1], [0, 0, 1, 1], [], []>} : vector<8x64xbf16>, vector<64x96xbf16>, vector<8x96xf32> -> vector<8x96xf32>
    %167 = vector.broadcast %6 : vector<1x96xf32> to vector<8x96xf32>
    %168 = arith.addf %166, %167 : vector<8x96xf32>
    %169 = arith.truncf %159 : vector<8x32xf32> to vector<8x32xbf16>
    %cst_63 = arith.constant dense<0.000000e+00> : vector<8x64xf32>
    %170 = tpu.matmul %169, %4, %cst_63 {dimension_numbers = #tpu.dot_dimension_numbers<[1], [0], [0], [1], [0, 0, 1, 1], [], []>} : vector<8x32xbf16>, vector<32x64xbf16>, vector<8x64xf32> -> vector<8x64xf32>
    %171 = vector.extract_strided_slice %168 {offsets = [0, 0], sizes = [8, 64], strides = [1, 1]} : vector<8x96xf32> to vector<8x64xf32>
    %172 = arith.addf %171, %170 : vector<8x64xf32>
    %173 = arith.negf %172 : vector<8x64xf32>
    %174 = math.exp %173 : vector<8x64xf32>
    %cst_64 = arith.constant 1.000000e+00 : f32
    %175 = vector.broadcast %cst_64 : f32 to vector<8x64xf32>
    %176 = arith.addf %175, %174 : vector<8x64xf32>
    %177 = arith.divf %175, %176 : vector<8x64xf32>
    %178 = vector.extract_strided_slice %177 {offsets = [0, 0], sizes = [8, 32], strides = [1, 1]} : vector<8x64xf32> to vector<8x32xf32>
    %179 = vector.extract_strided_slice %177 {offsets = [0, 32], sizes = [8, 32], strides = [1, 1]} : vector<8x64xf32> to vector<8x32xf32>
    %180 = vector.extract_strided_slice %168 {offsets = [0, 64], sizes = [8, 32], strides = [1, 1]} : vector<8x96xf32> to vector<8x32xf32>
    %181 = arith.mulf %178, %159 : vector<8x32xf32>
    %182 = arith.truncf %181 : vector<8x32xf32> to vector<8x32xbf16>
    %cst_65 = arith.constant dense<0.000000e+00> : vector<8x32xf32>
    %183 = tpu.matmul %182, %5, %cst_65 {dimension_numbers = #tpu.dot_dimension_numbers<[1], [0], [0], [1], [0, 0, 1, 1], [], []>} : vector<8x32xbf16>, vector<32x32xbf16>, vector<8x32xf32> -> vector<8x32xf32>
    %184 = arith.addf %180, %183 : vector<8x32xf32>
    %cst_66 = arith.constant 1.000000e+00 : f32
    %185 = vector.broadcast %cst_66 : f32 to vector<8x32xf32>
    %186 = arith.subf %185, %179 : vector<8x32xf32>
    %187 = arith.mulf %186, %159 : vector<8x32xf32>
    %188 = math.tanh %184 : vector<8x32xf32>
    %189 = arith.mulf %179, %188 : vector<8x32xf32>
    %190 = arith.addf %187, %189 : vector<8x32xf32>
    %c5_67 = arith.constant 5 : index
    %c0_68 = arith.constant 0 : index
    %c0_69 = arith.constant 0 : index
    %191 = vector.load %arg8[%c5_67, %c0_68, %c0_69] : memref<8x8x32xf32, #tpu.memory_space<vmem>>, vector<1x8x32xf32>
    %192 = vector.shape_cast %191 : vector<1x8x32xf32> to vector<8x32xf32>
    %193 = vector.shape_cast %190 : vector<8x32xf32> to vector<1x8x32xf32>
    tpu.vector_store %arg8[%c5_67, %c0_68, %c0_69], %193 {strides = array<i32>} : memref<8x8x32xf32, #tpu.memory_space<vmem>>, vector<1x8x32xf32>,
    %c6 = arith.constant 6 : index
    %c0_70 = arith.constant 0 : index
    %c0_71 = arith.constant 0 : index
    %194 = vector.load %arg2[%c6, %c0_70, %c0_71] : memref<8x8x64xf32, #tpu.memory_space<vmem>>, vector<1x8x64xf32>
    %195 = vector.shape_cast %194 : vector<1x8x64xf32> to vector<8x64xf32>
    %196 = arith.truncf %195 : vector<8x64xf32> to vector<8x64xbf16>
    %cst_72 = arith.constant dense<0.000000e+00> : vector<8x96xf32>
    %197 = tpu.matmul %196, %3, %cst_72 {dimension_numbers = #tpu.dot_dimension_numbers<[1], [0], [0], [1], [0, 0, 1, 1], [], []>} : vector<8x64xbf16>, vector<64x96xbf16>, vector<8x96xf32> -> vector<8x96xf32>
    %198 = vector.broadcast %6 : vector<1x96xf32> to vector<8x96xf32>
    %199 = arith.addf %197, %198 : vector<8x96xf32>
    %200 = arith.truncf %190 : vector<8x32xf32> to vector<8x32xbf16>
    %cst_73 = arith.constant dense<0.000000e+00> : vector<8x64xf32>
    %201 = tpu.matmul %200, %4, %cst_73 {dimension_numbers = #tpu.dot_dimension_numbers<[1], [0], [0], [1], [0, 0, 1, 1], [], []>} : vector<8x32xbf16>, vector<32x64xbf16>, vector<8x64xf32> -> vector<8x64xf32>
    %202 = vector.extract_strided_slice %199 {offsets = [0, 0], sizes = [8, 64], strides = [1, 1]} : vector<8x96xf32> to vector<8x64xf32>
    %203 = arith.addf %202, %201 : vector<8x64xf32>
    %204 = arith.negf %203 : vector<8x64xf32>
    %205 = math.exp %204 : vector<8x64xf32>
    %cst_74 = arith.constant 1.000000e+00 : f32
    %206 = vector.broadcast %cst_74 : f32 to vector<8x64xf32>
    %207 = arith.addf %206, %205 : vector<8x64xf32>
    %208 = arith.divf %206, %207 : vector<8x64xf32>
    %209 = vector.extract_strided_slice %208 {offsets = [0, 0], sizes = [8, 32], strides = [1, 1]} : vector<8x64xf32> to vector<8x32xf32>
    %210 = vector.extract_strided_slice %208 {offsets = [0, 32], sizes = [8, 32], strides = [1, 1]} : vector<8x64xf32> to vector<8x32xf32>
    %211 = vector.extract_strided_slice %199 {offsets = [0, 64], sizes = [8, 32], strides = [1, 1]} : vector<8x96xf32> to vector<8x32xf32>
    %212 = arith.mulf %209, %190 : vector<8x32xf32>
    %213 = arith.truncf %212 : vector<8x32xf32> to vector<8x32xbf16>
    %cst_75 = arith.constant dense<0.000000e+00> : vector<8x32xf32>
    %214 = tpu.matmul %213, %5, %cst_75 {dimension_numbers = #tpu.dot_dimension_numbers<[1], [0], [0], [1], [0, 0, 1, 1], [], []>} : vector<8x32xbf16>, vector<32x32xbf16>, vector<8x32xf32> -> vector<8x32xf32>
    %215 = arith.addf %211, %214 : vector<8x32xf32>
    %cst_76 = arith.constant 1.000000e+00 : f32
    %216 = vector.broadcast %cst_76 : f32 to vector<8x32xf32>
    %217 = arith.subf %216, %210 : vector<8x32xf32>
    %218 = arith.mulf %217, %190 : vector<8x32xf32>
    %219 = math.tanh %215 : vector<8x32xf32>
    %220 = arith.mulf %210, %219 : vector<8x32xf32>
    %221 = arith.addf %218, %220 : vector<8x32xf32>
    %c6_77 = arith.constant 6 : index
    %c0_78 = arith.constant 0 : index
    %c0_79 = arith.constant 0 : index
    %222 = vector.load %arg8[%c6_77, %c0_78, %c0_79] : memref<8x8x32xf32, #tpu.memory_space<vmem>>, vector<1x8x32xf32>
    %223 = vector.shape_cast %222 : vector<1x8x32xf32> to vector<8x32xf32>
    %224 = vector.shape_cast %221 : vector<8x32xf32> to vector<1x8x32xf32>
    tpu.vector_store %arg8[%c6_77, %c0_78, %c0_79], %224 {strides = array<i32>} : memref<8x8x32xf32, #tpu.memory_space<vmem>>, vector<1x8x32xf32>,
    %c7 = arith.constant 7 : index
    %c0_80 = arith.constant 0 : index
    %c0_81 = arith.constant 0 : index
    %225 = vector.load %arg2[%c7, %c0_80, %c0_81] : memref<8x8x64xf32, #tpu.memory_space<vmem>>, vector<1x8x64xf32>
    %226 = vector.shape_cast %225 : vector<1x8x64xf32> to vector<8x64xf32>
    %227 = arith.truncf %226 : vector<8x64xf32> to vector<8x64xbf16>
    %cst_82 = arith.constant dense<0.000000e+00> : vector<8x96xf32>
    %228 = tpu.matmul %227, %3, %cst_82 {dimension_numbers = #tpu.dot_dimension_numbers<[1], [0], [0], [1], [0, 0, 1, 1], [], []>} : vector<8x64xbf16>, vector<64x96xbf16>, vector<8x96xf32> -> vector<8x96xf32>
    %229 = vector.broadcast %6 : vector<1x96xf32> to vector<8x96xf32>
    %230 = arith.addf %228, %229 : vector<8x96xf32>
    %231 = arith.truncf %221 : vector<8x32xf32> to vector<8x32xbf16>
    %cst_83 = arith.constant dense<0.000000e+00> : vector<8x64xf32>
    %232 = tpu.matmul %231, %4, %cst_83 {dimension_numbers = #tpu.dot_dimension_numbers<[1], [0], [0], [1], [0, 0, 1, 1], [], []>} : vector<8x32xbf16>, vector<32x64xbf16>, vector<8x64xf32> -> vector<8x64xf32>
    %233 = vector.extract_strided_slice %230 {offsets = [0, 0], sizes = [8, 64], strides = [1, 1]} : vector<8x96xf32> to vector<8x64xf32>
    %234 = arith.addf %233, %232 : vector<8x64xf32>
    %235 = arith.negf %234 : vector<8x64xf32>
    %236 = math.exp %235 : vector<8x64xf32>
    %cst_84 = arith.constant 1.000000e+00 : f32
    %237 = vector.broadcast %cst_84 : f32 to vector<8x64xf32>
    %238 = arith.addf %237, %236 : vector<8x64xf32>
    %239 = arith.divf %237, %238 : vector<8x64xf32>
    %240 = vector.extract_strided_slice %239 {offsets = [0, 0], sizes = [8, 32], strides = [1, 1]} : vector<8x64xf32> to vector<8x32xf32>
    %241 = vector.extract_strided_slice %239 {offsets = [0, 32], sizes = [8, 32], strides = [1, 1]} : vector<8x64xf32> to vector<8x32xf32>
    %242 = vector.extract_strided_slice %230 {offsets = [0, 64], sizes = [8, 32], strides = [1, 1]} : vector<8x96xf32> to vector<8x32xf32>
    %243 = arith.mulf %240, %221 : vector<8x32xf32>
    %244 = arith.truncf %243 : vector<8x32xf32> to vector<8x32xbf16>
    %cst_85 = arith.constant dense<0.000000e+00> : vector<8x32xf32>
    %245 = tpu.matmul %244, %5, %cst_85 {dimension_numbers = #tpu.dot_dimension_numbers<[1], [0], [0], [1], [0, 0, 1, 1], [], []>} : vector<8x32xbf16>, vector<32x32xbf16>, vector<8x32xf32> -> vector<8x32xf32>
    %246 = arith.addf %242, %245 : vector<8x32xf32>
    %cst_86 = arith.constant 1.000000e+00 : f32
    %247 = vector.broadcast %cst_86 : f32 to vector<8x32xf32>
    %248 = arith.subf %247, %241 : vector<8x32xf32>
    %249 = arith.mulf %248, %221 : vector<8x32xf32>
    %250 = math.tanh %246 : vector<8x32xf32>
    %251 = arith.mulf %241, %250 : vector<8x32xf32>
    %252 = arith.addf %249, %251 : vector<8x32xf32>
    %c7_87 = arith.constant 7 : index
    %c0_88 = arith.constant 0 : index
    %c0_89 = arith.constant 0 : index
    %253 = vector.load %arg8[%c7_87, %c0_88, %c0_89] : memref<8x8x32xf32, #tpu.memory_space<vmem>>, vector<1x8x32xf32>
    %254 = vector.shape_cast %253 : vector<1x8x32xf32> to vector<8x32xf32>
    %255 = vector.shape_cast %252 : vector<8x32xf32> to vector<1x8x32xf32>
    tpu.vector_store %arg8[%c7_87, %c0_88, %c0_89], %255 {strides = array<i32>} : memref<8x8x32xf32, #tpu.memory_space<vmem>>, vector<1x8x32xf32>,
    %c0_90 = arith.constant 0 : index
    %c0_91 = arith.constant 0 : index
    %256 = vector.load %arg9[%c0_90, %c0_91] : memref<8x32xf32, #tpu.memory_space<vmem>>, vector<8x32xf32>
    tpu.vector_store %arg9[%c0_90, %c0_91], %252 {strides = array<i32>} : memref<8x32xf32, #tpu.memory_space<vmem>>, vector<8x32xf32>,
    return
  }
  func.func @transform_0(%arg0: i32, %arg1: i32) -> (i32, i32, i32) {
    %c0_i32 = arith.constant 0 : i32
    %c0_i32_0 = arith.constant 0 : i32
    return %arg1, %arg0, %c0_i32 : i32, i32, i32
  }
  func.func @transform_1(%arg0: i32, %arg1: i32) -> (i32, i32) {
    %c0_i32 = arith.constant 0 : i32
    %c0_i32_0 = arith.constant 0 : i32
    return %arg0, %c0_i32 : i32, i32
  }
  func.func @transform_2(%arg0: i32, %arg1: i32) -> (i32, i32) {
    %c0_i32 = arith.constant 0 : i32
    %c0_i32_0 = arith.constant 0 : i32
    %c0_i32_1 = arith.constant 0 : i32
    return %c0_i32, %c0_i32_0 : i32, i32
  }
  func.func @transform_3(%arg0: i32, %arg1: i32) -> (i32, i32) {
    %c0_i32 = arith.constant 0 : i32
    %c0_i32_0 = arith.constant 0 : i32
    %c0_i32_1 = arith.constant 0 : i32
    return %c0_i32, %c0_i32_0 : i32, i32
  }
  func.func @transform_4(%arg0: i32, %arg1: i32) -> (i32, i32) {
    %c0_i32 = arith.constant 0 : i32
    %c0_i32_0 = arith.constant 0 : i32
    %c0_i32_1 = arith.constant 0 : i32
    return %c0_i32, %c0_i32_0 : i32, i32
  }
  func.func @transform_5(%arg0: i32, %arg1: i32) -> (i32, i32) {
    %c0_i32 = arith.constant 0 : i32
    %c0_i32_0 = arith.constant 0 : i32
    %c0_i32_1 = arith.constant 0 : i32
    return %c0_i32, %c0_i32_0 : i32, i32
  }
  func.func @transform_6(%arg0: i32, %arg1: i32) -> (i32, i32, i32) {
    %c0_i32 = arith.constant 0 : i32
    %c0_i32_0 = arith.constant 0 : i32
    return %arg1, %arg0, %c0_i32 : i32, i32, i32
  }
}

</mosaic_0001>

<bundles_post_ra>
// kernel: axis_cell_scan.1
= control target key start
LH: loop header
LB: loop body
LE: loop exit
PB: predicated region body
PF: predicated region fallthrough
CT: control target
= control target key end

     0   :  { %s2470_s0 = inlined_call_operand.hbm [shape: f32[16,16,64], index: 0, kind: input, shape index: {}]   ;;  %s2471_s1 = inlined_call_operand.hbm [shape: f32[16,32], index: 1, kind: input, shape index: {}]   ;;  %s2472_s2 = inlined_call_operand.hbm [shape: bf16[64,96], index: 2, kind: input, shape index: {}]   ;;  %s2473_s3 = inlined_call_operand.hbm [shape: bf16[32,64], index: 3, kind: input, shape index: {}]   ;;  %s2474_s4 = inlined_call_operand.hbm [shape: bf16[32,32], index: 4, kind: input, shape index: {}]   ;;  %s2475_s5 = inlined_call_operand.vmem [shape: f32[1,96], index: 5, kind: input, shape index: {}]   ;;  %s2476_s6 = inlined_call_operand.hbm [shape: f32[16,16,32], index: 6, kind: output, shape index: {}]  }
   0x1   :  { %2484 = sst [smem:[#allocation23_spill]] %s2470_s0 }
   0x2   :  { %2485 = sst [smem:[#allocation24_spill]] %s2472_s2 }
   0x3   :  { %2486 = sst [smem:[#allocation25_spill]] %s2473_s3 }
   0x4   :  { %2487 = sst [smem:[#allocation26_spill]] %s2474_s4 }
   0x5   :  { %2488 = sst [smem:[#allocation27_spill]] %s2476_s6 }
   0x6   :  { %11 = vsyncpa [#allocation4], 0 }
   0x7   :  { %13 = vsyncpa [#allocation4 + $0x1], 0 }
   0x8   :  { %14 = vsyncpa [#allocation7], 0 }
   0x9   :  { %16 = vsyncpa [#allocation7 + $0x1], 0 }
   0xa   :  { %17 = vsyncpa [#allocation10], 0 }
   0xb   :  { %18 = vsyncpa [#allocation5], 0 }
   0xc   :  { %20 = vsyncpa [#allocation5 + $0x1], 0  ;;  %s2040_s21 = smov 0   ;;  %s2042_s22 = smov 0  }
   0xd   :  { %s2044_s23 = smov 0   ;;  %s2046_s24 = smov 0  }
   0xe   :  { %s2048_s25 = smov 0   ;;  %s2050_s26 = smov 0  }
   0xf   :  { %s2052_s27 = smov 0   ;;  %s2054_s28 = smov 0  }
  0x10   :  { %s2056_s29 = smov 0   ;;  %s2058_s30 = smov 0  }
  0x11   :  { %s2060_s7 = smov 0  }
  0x12 LB: > { %2489 = sst [smem:[#allocation18_spill]] %s1961_s24  ;;  %s2096_s8 = sadd.s32 4294967295, %s1989_s7   ;;  %s1989_s7 = sphi %s2060_s7, %s26_s7   ;;  %s1985_s30 = sphi %s2058_s30, %s2520_s30   ;;  %s1981_s29 = sphi %s2056_s29, %s2519_s29   ;;  %s1977_s28 = sphi %s2054_s28, %s2518_s28   ;;  %s1973_s27 = sphi %s2052_s27, %s2509_s27   ;;  %s1969_s26 = sphi %s2050_s26, %s2517_s26   ;;  %s1965_s25 = sphi %s2048_s25, %s2516_s25   ;;  %s1961_s24 = sphi %s2046_s24, %s2515_s24   ;;  %s1957_s23 = sphi %s2044_s23, %s2514_s23   ;;  %s1953_s22 = sphi %s2042_s22, %s2513_s22   ;;  %s1949_s21 = sphi %s2040_s21, %s2512_s21  }
  0x13   : > { %2490 = sst [smem:[#allocation19_spill]] %s1981_s29  ;;  %s1393_s9 = sadd.s32 4294967294, %s1989_s7  }
  0x14   : > { %p60_p0 = scmp.ne.s32.totalorder %s1965_s25, %s1961_s24  ;;  %p61_p1 = scmp.eq.s32.totalorder %s2096_s8, 0 }
  0x15   : > { %p196_p2 = scmp.eq.s32.totalorder %s2096_s8, 3  ;;  %p202_p3 = scmp.eq.s32.totalorder %s1393_s9, 3 }
  0x16   : > { %p2105_p4 = por %p61_p1, %p60_p0  ;;  %p1394_p5 = scmp.ge.s32.totalorder %s1989_s7, 1 }
  0x17   : > { %p2110_p6 = por %p202_p3, %p60_p0  ;;  %p209_p7 = scmp.lt.s32.totalorder %s1989_s7, 5 }
  0x18   : > { %s2494_s2 = sld [smem:[#allocation24_spill]]  ;;  %s1991_s16 = smov [#allocation8]  }
  0x19   : > { %s2492_s11 = scalar_select %p2110_p6, 1, 0 }
  0x1a   : > { %p2118_p8 = pnand %p1394_p5, %p209_p7  ;;  %s222_s17 = sshll.u32 %s1991_s16, 4  ;;  %s223_s17 = int_to_ptr.vmem [resolvable:$true] %s222_s17 }
  0x1b   : > { %2493 = sst [smem:[#allocation20_spill]] %s2492_s11  ;;  %s1992_s12 = smov 64  }
  0x1c   : > { %p1525_p9 = pneg %p2118_p8  ;;  %s2497_s3 = sld [smem:[#allocation25_spill]] }
  0x1d   : > { %s1993_s13 = smov 4   ;;  %s1994_s16 = smov [#allocation9]  }
  0x1e   : > { %s220_s14 = sshll.u32 %s2494_s2, 4  ;;  %p2126_p10 = pnand %p1525_p9, %p61_p1  ;;  %s221_s14 = int_to_ptr.hbm [resolvable:$true] %s220_s14 }
  0x1f   : > { %s236_s2 = sshll.u32 %s1994_s16, 4  ;;  %s2498_s4 = sld [smem:[#allocation26_spill]]  ;;  %s237_s2 = int_to_ptr.vmem [resolvable:$true] %s236_s2 }
  0x20   : > { %1528 = dma.hbm_to_vmem [thread:$0]  (!%p2126_p10), %s221_s14, 512, %s223_s17, [#allocation7], %s1992_s12, %s1992_s12, %s1993_s13  }
  0x21   : > { %s1995_s20 = smov [#allocation11]   ;;  %s35_s14 = sadd.s32 1, %s1981_s29 }
  0x22   : > { %s234_s9 = sshll.u32 %s2497_s3, 4  ;;  %s250_s3 = sshll.u32 %s1995_s20, 4  ;;  %s235_s9 = int_to_ptr.hbm [resolvable:$true] %s234_s9  ;;  %s251_s3 = int_to_ptr.vmem [resolvable:$true] %s250_s3 }
  0x23   : > { %1531 = dma.hbm_to_vmem [thread:$0]  (!%p2126_p10), %s235_s9, 256, %s237_s2, [#allocation10], %s1992_s12, %s1992_s12, %s1993_s13  }
  0x24   : > { %p36_p11 = scmp.ge.s32.totalorder %s35_s14, 2  ;;  %s38_s24 = sadd.s32 1, %s1985_s30 }
  0x25   : > { %s248_s19 = sshll.u32 %s2498_s4, 4  ;;  %s47_s11 = sadd.s32 1, %s1969_s26  ;;  %s249_s19 = int_to_ptr.hbm [resolvable:$true] %s248_s19 }
  0x26   : > { %1534 = dma.hbm_to_vmem [thread:$0]  (!%p2126_p10), %s249_s19, 256, %s251_s3, [#allocation10], %s1992_s12, %s1992_s12, %s1993_s13  }
  0x27   : > { %p54_p12 = scmp.ne.s32.totalorder %s1969_s26, %s1965_s25  ;;  %s2522_s14 = smov (%p36_p11, %s35_s14), 0 }
  0x28   : > { %2499 = sst [smem:[#allocation21_spill]] %s2522_s14  ;;  %s2524_s24 = smov (!%p36_p11, %s38_s24), %s1985_s30 }
  0x29   : > { %s42_s2 = ssub.s32 %s1981_s29, %s2522_s14  ;;  %p55_p13 = scmp.eq.s32.totalorder %s1989_s7, 0 }
  0x2a   : > { %p40_p0 = scmp.ge.s32.totalorder %s2524_s24, 2  ;;  %p2155_p3 = por %p196_p2, %p54_p12 }
  0x2b   : > { %p2161_p5 = por %p55_p13, %p54_p12  ;;  %p1549_p7 = scmp.lt.s32.totalorder %s1989_s7, 4 }
  0x2c   : > { %s2500_s17 = scalar_select %p2155_p3, 1, 0 }
  0x2d   : > { %s2526_s24 = smov (%p40_p0, %s2524_s24), 0  ;;  %s267_s18 = sand.u32 1, %s1969_s26  }
  0x2e   : > { %2501 = sst [smem:[#allocation22_spill]] %s2500_s17  ;;  %s1497_s9 = sshll.u32 %s1981_s29, 4 }
  0x2f   : > { %s43_s12 = ssub.s32 %s1985_s30, %s2526_s24  ;;  %s1399_s16 = sshll.u32 %s267_s18, 6 }
  0x30   : > { %s44_s13 = sor.u32 %s43_s12, %s42_s2  ;;  %s276_s19 = sadd.s32 %s1985_s30, %s1497_s9 }
  0x31   : > { %p45_p2 = scmp.eq.s32.totalorder %s44_s13, 0  ;;  %s271_s20 = scalar_lea.vmem [#allocation3], %s1399_s16 }
  0x32   : > { %s281_s4 = sshll.u32 %s271_s20, 4  ;;  %s1402_s6 = sshll.u32 %s276_s19, 3  ;;  %s282_s4 = int_to_ptr.vmem [resolvable:$true] %s281_s4 }
  0x33   : > { %s2174_s14 = scalar_select %p45_p2, %s1969_s26, %s47_s11  }
  0x34   : > { %s2503_s0 = sld [smem:[#allocation23_spill]]  ;;  %p1536_p9 = pnand %p1549_p7, %p2161_p5 }
  0x35   : > { %s268_s13 = scalar_lea.sflag [#allocation4], %s267_s18  ;;  %s1996_s11 = smov 256  }
  0x36   : > { %s1997_s16 = smov 128   ;;  %s1998_s20 = smov 8  }
  0x37   : > { %p71_p10 = scmp.eq.s32.totalorder %s43_s12, 0  ;;  %s73_s19 = sadd.s32 1, %s1957_s23 }
  0x38   : > { %p80_p11 = scmp.ne.s32.totalorder %s1957_s23, %s1953_s22  ;;  %p86_p12 = scmp.ne.s32.totalorder %s1953_s22, %s1949_s21 }
  0x39   : > { %s2189_s29 = scalar_select %p71_p10, %s1957_s23, %s73_s19  }
  0x3a   : > { %s278_s2 = scalar_lea.hbm %s2503_s0, %s1402_s6  ;;  %p82_p0 = por %p80_p11, %p55_p13 }
  0x3b   : > { %s279_s9 = sshll.u32 %s278_s2, 4  ;;  %p2195_p5 = por %p86_p12, %p61_p1  ;;  %s280_s9 = int_to_ptr.hbm [resolvable:$true] %s279_s9 }
  0x3c   : > { %1538 = dma.hbm_to_vmem [thread:$0]  (!%p1536_p9), %s280_s9, 1024, %s282_s4, %s268_s13, %s1996_s11, %s1997_s16, %s1998_s20  }
  0x3d   : > { %s291_s17 = sand.u32 1, %s1989_s7   ;;  %s293_s3 = sand.u32 1, %s1957_s23  }
  0x3e   : > { %s1403_s18 = sshll.u32 %s293_s3, 3  ;;  %s1404_s2 = sshll.u32 %s1985_s30, 3 }
  0x3f   : > { %s299_s12 = scalar_lea.hbm %s2471_s1, %s1404_s2  ;;  %s295_s9 = scalar_lea.vmem [#allocation6], %s1403_s18 }
  0x40   : > { %s303_s13 = sshll.u32 %s295_s9, 4  ;;  %s301_s21 = sshll.u32 %s299_s12, 4  ;;  %s304_s13 = int_to_ptr.vmem [resolvable:$true] %s303_s13  ;;  %s302_s21 = int_to_ptr.hbm [resolvable:$true] %s301_s21 }
  0x41   : > { %p1539_p13 = pnand %p1549_p7, %p82_p0  ;;  %s292_s11 = scalar_lea.sflag [#allocation7], %s291_s17 }
  0x42   : > { %312 = sbr.rel (%p2118_p8) target bundleno = 5159 (0x1427), region = 44  ;;  %s2210_s16 = sand.u32 (!%p2118_p8), 1, %s1965_s25  }
  0x43   : > { %1541 = dma.hbm_to_vmem [thread:$0]  (!%p1539_p13), %s302_s21, 128, %s304_s13, %s292_s11  }
  0x44   : > { %s1406_s0 = sshll.u32 (!%p2118_p8), %s2210_s16, 6  ;;  %s315_s20 = scalar_lea.sflag (!%p2118_p8), [#allocation4], %s2210_s16 }
  0x45   : > { %s2214_s19 = scalar_lea.vmem (!%p2118_p8), [#allocation3], %s1406_s0 }
  0x47   : > { %1928 = dma.done.wait (%p2105_p4), %s315_s20, 1024  }
  0x48   : > { %1930 = vsyncadd (%p2105_p4), %s315_s20, 4294966272  ;;  %s324_s15 = sand.u32 1, %s2096_s8   ;;  %s326_s17 = sand.u32 1, %s1953_s22  }
  0x49   : > { %s1407_s3 = sshll.u32 %s326_s17, 3  ;;  %s325_s18 = scalar_lea.sflag [#allocation7], %s324_s15 }
  0x4a   : > { %s328_s2 = scalar_lea.vmem [#allocation6], %s1407_s3 }
  0x4b   : > { %1932 = dma.done.wait (%p2195_p5), %s325_s18, 128  }
  0x4c   : > { %1934 = vsyncadd (%p2195_p5), %s325_s18, 4294967168 }
  0x4d   : > { %1936 = dma.done.wait (%p61_p1), [#allocation7], 512  }
  0x4e   : > { %1938 = vsyncadd (%p61_p1), [#allocation7], 4294966784 }
  0x4f   : > { %1940 = dma.done.wait (%p61_p1), [#allocation10], 512  }
  0x50   : > { %1942 = vsyncadd (%p61_p1), [#allocation10], 4294966784  ;;  %s2234_s10 = scalar_lea.vmem [#allocation12], %s1406_s0  ;;  %p1412_p4 = scmp.ne.s32.totalorder %s1973_s27, 0 }
  0x52   : > { %384 = sbr.rel (%p1412_p4) target bundleno = 89 (0x59), region = 68 }
  0x57   : > { %v385_v0 = vld [vmem:[%s328_s2] sm:$0xff]  ;;  %vm386_vm0 = vcmask 261120  }
  0x58   : > { %387 = vst.msk [vmem:[#allocation2] sm:$0xff] %vm386_vm0, %v385_v0 }
  0x59 PF: > { %v2237_v1 = vld [vmem:[#allocation8 + $0x18] sm:$0xff]  ;;  %v2239_v2 = vld [vmem:[#allocation9 + $0x8] sm:$0xff]  ;;  %v2241_v3 = vld [vmem:[#allocation8 + $0x10] sm:$0xff]  ;;  %vm465_vm1 = vcmask 261120   ;;  %vm435_vm2 = vcmask 523264   ;;  %s1999_s4 = smov 64  }
  0x5a   : > { %443 = vmatpush.bf16.msra.mxu0 %v2237_v1  ;;  %475 = vmatpush.bf16.msra.mxu1 %v2239_v2  ;;  %v2245_v4 = vld [vmem:[#allocation9] sm:$0xff]  ;;  %v2254_v7 = vld [vmem:[#allocation8 + $0x8] sm:$0xff]  ;;  %v406_v9 = vld [vmem:[%s2214_s19] sm:$0xff]  ;;  %s2000_s12 = smov 32   ;;  %s2001_s9 = smov 96  }
  0x5b   : > { %565 = vmatpush.bf16.msra.mxu3 %v2237_v1  ;;  %v2260_v8 = vld [vmem:[#allocation8] sm:$0xff]  ;;  %v407_v10 = vpack.c.bf16 %v406_v9, %v406_v9  ;;  %v2276_v11 = vld [vmem:[#allocation11 + $0x8] sm:$0xff]  ;;  %v2279_v13 = vld [vmem:[#allocation11] sm:$0xff]  ;;  %s1506_s13 = sshll.u32 %s1973_s27, 4  ;;  %s2506_s15 = sld [smem:[#allocation27_spill]] }
  0x5c   : > { %525 = vmatpush.bf16.msra.mxu2 %v2276_v11  ;;  %v2285_v14 = vld [vmem:[%s2475_s5] ss:$0 sm:$0xff]  ;;  %v1449_v47 = vld [vmem:[%s2214_s19 + $0x8] sm:$0xff]  ;;  %s1247_s11 = sadd.s32 %s1977_s28, %s1506_s13  ;;  %s1250_s3 = sshll.u32 %s2234_s10, 4  ;;  %s1251_s3 = int_to_ptr.vmem [resolvable:$true] %s1250_s3 }
  0x5d   : > { %v557_v48 = vpack.c.bf16 %v1449_v47, %v1449_v47  ;;  %s1494_s0 = sshll.u32 %s1247_s11, 3  ;;  %s1236_s2 = scalar_lea.sflag [#allocation5], %s2210_s16 }
  0x5e   : > { %444 = vmatpush.bf16.msra.mxu0 %v2241_v3  ;;  %476 = vmatpush.bf16.msra.mxu1 %v2245_v4 }
  0x5f   : > { %v2247_v5 = vld [vmem:[#allocation2] sm:$0xff]  ;;  %566 = vmatpush.bf16.msra.mxu3 %v2241_v3 }
  0x60   : > { %v452_v6 = vpack.c.bf16 %v2247_v5, %v2247_v5  ;;  %526 = vmatpush.bf16.msra.mxu2 %v2279_v13 }
  0x61   : > { %s1249_s17 = scalar_lea.hbm %s2506_s15, %s1494_s0 }
  0x62   : > { %587 = vmatpush.bf16.msrb.mxu1 %v2239_v2  ;;  %445 = vmatpush.bf16.msra.mxu0 %v2254_v7  ;;  %s1252_s18 = sshll.u32 %s1249_s17, 4  ;;  %s1253_s18 = int_to_ptr.hbm [resolvable:$true] %s1252_s18 }
  0x63   : > { %1438 = vmatmul.msk.bf16.vlgmr.msra.gmra.mxu1 %vm465_vm1, %v452_v6  ;;  %567 = vmatpush.bf16.msra.mxu3 %v2254_v7  ;;  %s1869_s8 = sshra.s32 %s1253_s18, 4  ;;  %s1870_s8 = int_to_ptr.hbm [resolvable:$true] %s1869_s8 }
  0x64   : > { %625 = vmatpush.bf16.msrb.mxu2 %v2276_v11  ;;  %s1871_s27 = scalar_lea.hbm %s1870_s8, 64  ;;  %p1876_p2 = scmp.lt.s32.totalorder %s1870_s8, %s2506_s15 }
  0x65   : > { %p1872_p1 = scmp.ne.s32.totalorder %s1870_s8, %s1871_s27 }
  0x66   : > { %588 = vmatpush.bf16.msrb.mxu1 %v2245_v4  ;;  %446 = vmatpush.bf16.msra.mxu0 %v2260_v8 }
  0x67   : > { %568 = vmatpush.bf16.msra.mxu3 %v2260_v8  ;;  %p1873_p8 = pnand %p1872_p1, %p2155_p3 }
  0x68   : > { %626 = vmatpush.bf16.msrb.mxu2 %v2279_v13 }
  0x69   : > { %1429 = vmatmul.msk.bf16.vlgmr.msra.gmra.mxu0 %vm435_vm2, %v407_v10  ;;  %p1874_p7 = pneg %p1873_p8 }
  0x6a   : > { %662 = vmatpush.bf16.msrb.mxu0 %v2237_v1  ;;  %722 = vmatpush.bf16.msra.mxu1 %v2276_v11 }
  0x6b   : > { %684 = vmatpush.bf16.msrb.mxu3 %v2239_v2 }
  0x6c   : > { %1450 = vmatmul.msk.bf16.vlgmr.msra.gmra.mxu3 %vm435_vm2, %v557_v48 }
  0x6e   : > { %663 = vmatpush.bf16.msrb.mxu0 %v2241_v3  ;;  %723 = vmatpush.bf16.msra.mxu1 %v2279_v13 }
  0x6f   : > { %685 = vmatpush.bf16.msrb.mxu3 %v2245_v4 }
  0x72   : > { %664 = vmatpush.bf16.msrb.mxu0 %v2254_v7 }
  0x73   : > { %819 = vmatpush.bf16.msra.mxu3 %v2276_v11 }
  0x76   : > { %665 = vmatpush.bf16.msrb.mxu0 %v2260_v8 }
  0x77   : > { %820 = vmatpush.bf16.msra.mxu3 %v2279_v13 }
  0x7a   : > { %781 = vmatpush.bf16.msra.mxu0 %v2239_v2 }
  0x7e   : > { %782 = vmatpush.bf16.msra.mxu0 %v2245_v4 }
  0xe0   : > { %v478_v12 = vpop.f32.mrf.mxu1 }
  0xe6   : > { %v448_v15 = vpop.f32.mrf.mxu0 }
  0xe7   : > { %v449_v17 = vadd.f32 %v2285_v14, %v448_v15 }
  0xe8   : > { %v480_v16 = vpop.f32.mrf.mxu1 }
  0xe9   : > { %v482_v18 = vadd.f32 %v478_v12, %v449_v17 }
  0xeb   : > { %v1439_v19 = vmul.f32 -1.442695, %v482_v18 }
  0xed   : > { %1657 = vpow2.f32 %v1439_v19 }
  0xee   : > { %v450_v20 = vpop.f32.mrf.mxu0 }
  0xef   : > { %v570_v51 = vpop.f32.mrf.mxu3 }
  0xf0   : > { %v571_v53 = vadd.f32 %v2285_v14, %v570_v51 }
  0xf3   : > { %v1658_v21 = vpop.eup %1657 }
  0xf4   : > { %v486_v22 = vadd.f32 1.0, %v1658_v21 }
  0xf6   : > { %1659 = vrcp.f32 %v486_v22  ;;  %v498_v26 = vand.u32 2147483648, %v486_v22  ;;  %v496_v28 = vand.u32 2147483647, %v486_v22  ;;  %vm492_vm4 = vweird.f32 %v486_v22 }
  0xf7   : > { %v572_v52 = vpop.f32.mrf.mxu3 }
  0xf8   : > { %v499_v30 = vor.u32 1.1754944e-38, %v498_v26  ;;  %vm497_vm6 = vcmp.eq.f32.partialorder %v496_v28, 8.507059e+37  ;;  %v1455_v28 = vld [vmem:[%s2214_s19 + $0x10] sm:$0xff] }
  0xfc   : > { %v1660_v23 = vpop.eup %1659 }
  0xfd   : > { %v488_v24 = vmul.f32 %v1660_v23, %v486_v22  ;;  %vm493_vm3 = vweird.f32 %v1660_v23 }
  0xfe   : > { %vm494_vm5 = vmor %vm492_vm4, %vm493_vm3 }
  0xff   : > { %v489_v25 = vsub.f32 1.0, %v488_v24 }
 0x101   : > { %v490_v27 = vmul.f32 %v1660_v23, %v489_v25 }
 0x103   : > { %v491_v29 = vadd.f32 %v1660_v23, %v490_v27 }
 0x105   : > { %v495_v31 = vsel %vm494_vm5, %v1660_v23, %v491_v29  ;;  %v654_v29 = vpack.c.bf16 %v1455_v28, %v1455_v28 }
 0x106   : > { %v500_v32 = vsel %vm497_vm6, %v499_v30, %v495_v31 }
 0x107   : > { %v502_v33 = vmul.f32 %v500_v32, %v2247_v5  ;;  %v537_v41 = vsub.f32 1.0, %v500_v32  ;;  %1456 = vmatmul.msk.bf16.vlgmr.msrb.gmra.mxu0 %vm435_vm2, %v654_v29 }
 0x108   : > { %916 = vmatpush.bf16.msrb.mxu0 %v2276_v11 }
 0x109   : > { %v503_v34 = vpack.c.bf16 %v502_v33, %v502_v33 }
 0x10b   : > { %1448 = vmatmul.msk.bf16.vlgmr.msra.gmra.mxu2 %vm465_vm1, %v503_v34 }
 0x10c   : > { %759 = vmatpush.bf16.msra.mxu2 %v2237_v1  ;;  %917 = vmatpush.bf16.msrb.mxu0 %v2279_v13 }
 0x110   : > { %760 = vmatpush.bf16.msra.mxu2 %v2241_v3 }
 0x114   : > { %761 = vmatpush.bf16.msra.mxu2 %v2254_v7 }
 0x118   : > { %762 = vmatpush.bf16.msra.mxu2 %v2260_v8 }
 0x18e   : > { %v528_v35 = vpop.f32.mrf.mxu2 }
 0x18f   : > { %533 = vrot.lane.b32.xlu0 %v528_v35, %s1999_s4 }
 0x196   : > { %v530_v36 = vpop.f32.mrf.mxu2 }
 0x197   : > { %539 = vrot.lane.b32.xlu0 %v2247_v5, %s2000_s12 }
 0x201   : > { %v534_v37 = vpop.permute.xlu0 %533 }
 0x202   : > { %v536_v38 = vadd.f32 %v534_v37, %v449_v17 }
 0x204   : > { %1661 = vtanh.f32 %v536_v38 }
 0x209   : > { %v540_v40 = vpop.permute.xlu0 %539 }
 0x20a   : > { %v1662_v39 = vpop.eup %1661  ;;  %v542_v43 = vmul.f32 %v540_v40, %v537_v41 }
 0x20b   : > { %545 = vrot.lane.b32.xlu1 %v1662_v39, %s2001_s9 }
 0x27d   : > { %v546_v42 = vpop.permute.xlu1 %545 }
 0x27e   : > { %v548_v44 = vmul.f32 %v546_v42, %v500_v32  ;;  %v667_v32 = vpop.f32.mrf.mxu0 }
 0x27f   : > { %v668_v34 = vadd.f32 %v2285_v14, %v667_v32 }
 0x280   : > { %v549_v45 = vadd.f32 %v548_v44, %v542_v43 }
 0x282   : > { %551 = vrot.lane.b32.xlu2 %v549_v45, %s2001_s9  ;;  %v574_v46 = vpack.c.bf16 %v549_v45, %v549_v45 }
 0x284   : > { %576 = vrot.lane.b32.xlu1 %v574_v46, %s2001_s9 }
 0x286   : > { %v669_v33 = vpop.f32.mrf.mxu0 }
 0x2dc   : > { %v552_v49 = vpop.permute.xlu2 %551 }
 0x2dd   : > { %554 = vst.msk [vmem:[%s2234_s10] sm:$0xff] %vm465_vm1, %v552_v49 }
 0x2f6   : > { %v577_v50 = vpop.permute.xlu1 %576 }
 0x2f7   : > { %1451 = vmatmul.msk.bf16.vlgmr.msrb.gmra.mxu1 %vm465_vm1, %v577_v50 }
 0x2f8   : > { %856 = vmatpush.bf16.msrb.mxu1 %v2237_v1 }
 0x2fc   : > { %857 = vmatpush.bf16.msrb.mxu1 %v2241_v3 }
 0x300   : > { %858 = vmatpush.bf16.msrb.mxu1 %v2254_v7 }
 0x304   : > { %859 = vmatpush.bf16.msrb.mxu1 %v2260_v8 }
 0x374   : > { %v590_v54 = vpop.f32.mrf.mxu1 }
 0x375   : > { %v594_v55 = vadd.f32 %v590_v54, %v571_v53 }
 0x377   : > { %v1452_v56 = vmul.f32 -1.442695, %v594_v55 }
 0x379   : > { %1663 = vpow2.f32 %v1452_v56 }
 0x37c   : > { %v592_v57 = vpop.f32.mrf.mxu1 }
 0x37f   : > { %v1664_v58 = vpop.eup %1663 }
 0x380   : > { %v598_v59 = vadd.f32 1.0, %v1664_v58  ;;  %v1461_v58 = vld [vmem:[%s2214_s19 + $0x18] sm:$0xff] }
 0x382   : > { %1665 = vrcp.f32 %v598_v59  ;;  %v610_v63 = vand.u32 2147483648, %v598_v59  ;;  %v608_v5 = vand.u32 2147483647, %v598_v59  ;;  %vm604_vm8 = vweird.f32 %v598_v59 }
 0x384   : > { %v611_v9 = vor.u32 1.1754944e-38, %v610_v63  ;;  %vm609_vm10 = vcmp.eq.f32.partialorder %v608_v5, 8.507059e+37 }
 0x388   : > { %v1666_v60 = vpop.eup %1665 }
 0x389   : > { %v600_v61 = vmul.f32 %v1666_v60, %v598_v59  ;;  %vm605_vm7 = vweird.f32 %v1666_v60  ;;  %v751_v59 = vpack.c.bf16 %v1461_v58, %v1461_v58 }
 0x38a   : > { %vm606_vm9 = vmor %vm604_vm8, %vm605_vm7 }
 0x38b   : > { %v601_v62 = vsub.f32 1.0, %v600_v61 }
 0x38d   : > { %v602_v0 = vmul.f32 %v1666_v60, %v601_v62 }
 0x38f   : > { %v603_v6 = vadd.f32 %v1666_v60, %v602_v0 }
 0x391   : > { %v607_v10 = vsel %vm606_vm9, %v1666_v60, %v603_v6 }
 0x392   : > { %v612_v12 = vsel %vm609_vm10, %v611_v9, %v607_v10 }
 0x393   : > { %v614_v15 = vmul.f32 %v612_v12, %v552_v49  ;;  %v637_v22 = vsub.f32 1.0, %v612_v12 }
 0x395   : > { %v615_v16 = vpack.c.bf16 %v614_v15, %v614_v15  ;;  %v638_v24 = vmul.f32 %v637_v22, %v549_v45 }
 0x397   : > { %1453 = vmatmul.msk.bf16.vlgmr.msrb.gmra.mxu2 %vm465_vm1, %v615_v16 }
 0x398   : > { %878 = vmatpush.bf16.msrb.mxu2 %v2239_v2 }
 0x39c   : > { %879 = vmatpush.bf16.msrb.mxu2 %v2245_v4 }
 0x3a7   : > { %1462 = vmatmul.msk.bf16.vlgmr.msra.gmra.mxu2 %vm435_vm2, %v751_v59 }
 0x3a8   : > { %1013 = vmatpush.bf16.msra.mxu2 %v2276_v11 }
 0x3ac   : > { %1014 = vmatpush.bf16.msra.mxu2 %v2279_v13 }
 0x41a   : > { %v628_v17 = vpop.f32.mrf.mxu2 }
 0x41b   : > { %633 = vrot.lane.b32.xlu2 %v628_v17, %s1999_s4 }
 0x422   : > { %v630_v18 = vpop.f32.mrf.mxu2 }
 0x42a   : > { %v764_v9 = vpop.f32.mrf.mxu2 }
 0x42b   : > { %v765_v15 = vadd.f32 %v2285_v14, %v764_v9 }
 0x432   : > { %v766_v10 = vpop.f32.mrf.mxu2 }
 0x475   : > { %v634_v19 = vpop.permute.xlu2 %633 }
 0x476   : > { %v636_v20 = vadd.f32 %v634_v19, %v571_v53 }
 0x478   : > { %1667 = vtanh.f32 %v636_v20 }
 0x47e   : > { %v1668_v21 = vpop.eup %1667 }
 0x47f   : > { %641 = vrot.lane.b32.xlu0 %v1668_v21, %s2001_s9 }
 0x4f1   : > { %v642_v23 = vpop.permute.xlu0 %641 }
 0x4f2   : > { %v644_v25 = vmul.f32 %v642_v23, %v612_v12 }
 0x4f4   : > { %v645_v26 = vadd.f32 %v644_v25, %v638_v24 }
 0x4f6   : > { %647 = vrot.lane.b32.xlu2 %v645_v26, %s2001_s9  ;;  %v671_v27 = vpack.c.bf16 %v645_v26, %v645_v26 }
 0x4f8   : > { %673 = vrot.lane.b32.xlu1 %v671_v27, %s2001_s9 }
 0x550   : > { %v648_v30 = vpop.permute.xlu2 %647 }
 0x551   : > { %1454 = vst.msk [vmem:[%s2234_s10 + $0x8] sm:$0xff] %vm465_vm1, %v648_v30 }
 0x56a   : > { %v674_v31 = vpop.permute.xlu1 %673 }
 0x56b   : > { %1457 = vmatmul.msk.bf16.vlgmr.msrb.gmra.mxu3 %vm465_vm1, %v674_v31 }
 0x56c   : > { %953 = vmatpush.bf16.msrb.mxu3 %v2237_v1 }
 0x570   : > { %954 = vmatpush.bf16.msrb.mxu3 %v2241_v3 }
 0x574   : > { %955 = vmatpush.bf16.msrb.mxu3 %v2254_v7 }
 0x578   : > { %956 = vmatpush.bf16.msrb.mxu3 %v2260_v8 }
 0x5ee   : > { %v687_v35 = vpop.f32.mrf.mxu3 }
 0x5ef   : > { %v691_v36 = vadd.f32 %v687_v35, %v668_v34 }
 0x5f1   : > { %v1458_v37 = vmul.f32 -1.442695, %v691_v36 }
 0x5f3   : > { %1669 = vpow2.f32 %v1458_v37 }
 0x5f6   : > { %v689_v38 = vpop.f32.mrf.mxu3 }
 0x5f9   : > { %v1670_v39 = vpop.eup %1669 }
 0x5fa   : > { %v695_v40 = vadd.f32 1.0, %v1670_v39  ;;  %v1467_v39 = vld [vmem:[%s2214_s19 + $0x20] sm:$0xff] }
 0x5fc   : > { %1671 = vrcp.f32 %v695_v40  ;;  %v707_v44 = vand.u32 2147483648, %v695_v40  ;;  %v705_v46 = vand.u32 2147483647, %v695_v40  ;;  %vm701_vm12 = vweird.f32 %v695_v40 }
 0x5fe   : > { %v708_v48 = vor.u32 1.1754944e-38, %v707_v44  ;;  %vm706_vm14 = vcmp.eq.f32.partialorder %v705_v46, 8.507059e+37 }
 0x602   : > { %v1672_v41 = vpop.eup %1671 }
 0x603   : > { %v697_v42 = vmul.f32 %v1672_v41, %v695_v40  ;;  %vm702_vm11 = vweird.f32 %v1672_v41  ;;  %v848_v40 = vpack.c.bf16 %v1467_v39, %v1467_v39 }
 0x604   : > { %vm703_vm13 = vmor %vm701_vm12, %vm702_vm11 }
 0x605   : > { %v698_v43 = vsub.f32 1.0, %v697_v42 }
 0x607   : > { %v699_v45 = vmul.f32 %v1672_v41, %v698_v43 }
 0x609   : > { %v700_v47 = vadd.f32 %v1672_v41, %v699_v45 }
 0x60b   : > { %v704_v49 = vsel %vm703_vm13, %v1672_v41, %v700_v47 }
 0x60c   : > { %v709_v50 = vsel %vm706_vm14, %v708_v48, %v704_v49 }
 0x60d   : > { %v711_v51 = vmul.f32 %v709_v50, %v648_v30  ;;  %v734_v60 = vsub.f32 1.0, %v709_v50 }
 0x60f   : > { %v712_v52 = vpack.c.bf16 %v711_v51, %v711_v51  ;;  %v735_v62 = vmul.f32 %v734_v60, %v645_v26 }
 0x611   : > { %1459 = vmatmul.msk.bf16.vlgmr.msra.gmra.mxu1 %vm465_vm1, %v712_v52 }
 0x612   : > { %975 = vmatpush.bf16.msra.mxu1 %v2239_v2 }
 0x616   : > { %976 = vmatpush.bf16.msra.mxu1 %v2245_v4 }
 0x621   : > { %1468 = vmatmul.msk.bf16.vlgmr.msrb.gmra.mxu1 %vm435_vm2, %v848_v40 }
 0x622   : > { %1110 = vmatpush.bf16.msrb.mxu1 %v2276_v11 }
 0x626   : > { %1111 = vmatpush.bf16.msrb.mxu1 %v2279_v13 }
 0x68e   : > { %v725_v53 = vpop.f32.mrf.mxu1 }
 0x68f   : > { %730 = vrot.lane.b32.xlu0 %v725_v53, %s1999_s4 }
 0x696   : > { %v727_v54 = vpop.f32.mrf.mxu1 }
 0x69e   : > { %v861_v47 = vpop.f32.mrf.mxu1 }
 0x69f   : > { %v862_v51 = vadd.f32 %v2285_v14, %v861_v47 }
 0x6a6   : > { %v863_v48 = vpop.f32.mrf.mxu1 }
 0x6a7   : > { %v1479_v48 = vld [vmem:[%s2214_s19 + $0x30] sm:$0xff] }
 0x701   : > { %v731_v55 = vpop.permute.xlu0 %730 }
 0x702   : > { %v733_v56 = vadd.f32 %v731_v55, %v668_v34 }
 0x704   : > { %1673 = vtanh.f32 %v733_v56 }
 0x70a   : > { %v1674_v57 = vpop.eup %1673 }
 0x70b   : > { %738 = vrot.lane.b32.xlu1 %v1674_v57, %s2001_s9 }
 0x77d   : > { %v739_v61 = vpop.permute.xlu1 %738 }
 0x77e   : > { %v741_v63 = vmul.f32 %v739_v61, %v709_v50 }
 0x780   : > { %v742_v0 = vadd.f32 %v741_v63, %v735_v62 }
 0x782   : > { %744 = vrot.lane.b32.xlu0 %v742_v0, %s2001_s9  ;;  %v768_v5 = vpack.c.bf16 %v742_v0, %v742_v0 }
 0x784   : > { %770 = vrot.lane.b32.xlu2 %v768_v5, %s2001_s9 }
 0x7de   : > { %v771_v6 = vpop.permute.xlu2 %770 }
 0x7df   : > { %1463 = vmatmul.msk.bf16.vlgmr.msra.gmra.mxu0 %vm465_vm1, %v771_v6 }
 0x7e0   : > { %1050 = vmatpush.bf16.msra.mxu0 %v2237_v1 }
 0x7e4   : > { %1051 = vmatpush.bf16.msra.mxu0 %v2241_v3 }
 0x7e8   : > { %1052 = vmatpush.bf16.msra.mxu0 %v2254_v7 }
 0x7ec   : > { %1053 = vmatpush.bf16.msra.mxu0 %v2260_v8 }
 0x7f4   : > { %v745_v12 = vpop.permute.xlu0 %744 }
 0x7f5   : > { %1460 = vst.msk [vmem:[%s2234_s10 + $0x10] sm:$0xff] %vm465_vm1, %v745_v12 }
 0x85c   : > { %v784_v16 = vpop.f32.mrf.mxu0 }
 0x85d   : > { %v788_v17 = vadd.f32 %v784_v16, %v765_v15 }
 0x85f   : > { %v1464_v18 = vmul.f32 -1.442695, %v788_v17 }
 0x861   : > { %1675 = vpow2.f32 %v1464_v18 }
 0x864   : > { %v786_v19 = vpop.f32.mrf.mxu0 }
 0x867   : > { %v1676_v20 = vpop.eup %1675 }
 0x868   : > { %v792_v21 = vadd.f32 1.0, %v1676_v20 }
 0x86a   : > { %1677 = vrcp.f32 %v792_v21  ;;  %v804_v25 = vand.u32 2147483648, %v792_v21  ;;  %v802_v27 = vand.u32 2147483647, %v792_v21  ;;  %vm798_vm0 = vweird.f32 %v792_v21 }
 0x86c   : > { %v805_v29 = vor.u32 1.1754944e-38, %v804_v25  ;;  %vm803_vm4 = vcmp.eq.f32.partialorder %v802_v27, 8.507059e+37 }
 0x870   : > { %v1678_v22 = vpop.eup %1677 }
 0x871   : > { %v794_v23 = vmul.f32 %v1678_v22, %v792_v21  ;;  %vm799_vm15 = vweird.f32 %v1678_v22 }
 0x872   : > { %vm800_vm3 = vmor %vm798_vm0, %vm799_vm15 }
 0x873   : > { %v795_v24 = vsub.f32 1.0, %v794_v23 }
 0x875   : > { %v796_v26 = vmul.f32 %v1678_v22, %v795_v24 }
 0x877   : > { %v797_v28 = vadd.f32 %v1678_v22, %v796_v26 }
 0x879   : > { %v801_v30 = vsel %vm800_vm3, %v1678_v22, %v797_v28 }
 0x87a   : > { %v806_v31 = vsel %vm803_vm4, %v805_v29, %v801_v30 }
 0x87b   : > { %v808_v32 = vmul.f32 %v806_v31, %v745_v12  ;;  %v831_v41 = vsub.f32 1.0, %v806_v31 }
 0x87d   : > { %v809_v33 = vpack.c.bf16 %v808_v32, %v808_v32  ;;  %v832_v43 = vmul.f32 %v831_v41, %v742_v0 }
 0x87f   : > { %1465 = vmatmul.msk.bf16.vlgmr.msra.gmra.mxu3 %vm465_vm1, %v809_v33 }
 0x880   : > { %1072 = vmatpush.bf16.msra.mxu3 %v2239_v2 }
 0x884   : > { %1073 = vmatpush.bf16.msra.mxu3 %v2245_v4 }
 0x902   : > { %v822_v34 = vpop.f32.mrf.mxu3 }
 0x903   : > { %827 = vrot.lane.b32.xlu1 %v822_v34, %s1999_s4 }
 0x90a   : > { %v824_v35 = vpop.f32.mrf.mxu3 }
 0x975   : > { %v828_v36 = vpop.permute.xlu1 %827 }
 0x976   : > { %v830_v37 = vadd.f32 %v828_v36, %v765_v15 }
 0x978   : > { %1679 = vtanh.f32 %v830_v37 }
 0x97e   : > { %v1680_v38 = vpop.eup %1679 }
 0x97f   : > { %835 = vrot.lane.b32.xlu2 %v1680_v38, %s2001_s9 }
 0x9d9   : > { %v836_v42 = vpop.permute.xlu2 %835 }
 0x9da   : > { %v838_v44 = vmul.f32 %v836_v42, %v806_v31 }
 0x9dc   : > { %v839_v45 = vadd.f32 %v838_v44, %v832_v43 }
 0x9de   : > { %841 = vrot.lane.b32.xlu1 %v839_v45, %s2001_s9  ;;  %v865_v46 = vpack.c.bf16 %v839_v45, %v839_v45 }
 0x9e0   : > { %867 = vrot.lane.b32.xlu0 %v865_v46, %s2001_s9 }
 0xa50   : > { %v842_v49 = vpop.permute.xlu1 %841 }
 0xa51   : > { %1466 = vst.msk [vmem:[%s2234_s10 + $0x18] sm:$0xff] %vm465_vm1, %v842_v49 }
 0xa52   : > { %v868_v50 = vpop.permute.xlu0 %867 }
 0xa53   : > { %1469 = vmatmul.msk.bf16.vlgmr.msrb.gmra.mxu2 %vm465_vm1, %v868_v50 }
 0xa54   : > { %1147 = vmatpush.bf16.msrb.mxu2 %v2237_v1 }
 0xa58   : > { %1148 = vmatpush.bf16.msrb.mxu2 %v2241_v3 }
 0xa5c   : > { %1149 = vmatpush.bf16.msrb.mxu2 %v2254_v7 }
 0xa60   : > { %1150 = vmatpush.bf16.msrb.mxu2 %v2260_v8 }
 0xad6   : > { %v881_v52 = vpop.f32.mrf.mxu2 }
 0xad7   : > { %v885_v53 = vadd.f32 %v881_v52, %v862_v51 }
 0xad9   : > { %v1470_v54 = vmul.f32 -1.442695, %v885_v53 }
 0xadb   : > { %1681 = vpow2.f32 %v1470_v54 }
 0xade   : > { %v883_v55 = vpop.f32.mrf.mxu2 }
 0xae1   : > { %v1682_v56 = vpop.eup %1681 }
 0xae2   : > { %v889_v57 = vadd.f32 1.0, %v1682_v56 }
 0xae4   : > { %1683 = vrcp.f32 %v889_v57  ;;  %v901_v1 = vand.u32 2147483648, %v889_v57  ;;  %v899_v3 = vand.u32 2147483647, %v889_v57  ;;  %vm895_vm6 = vweird.f32 %v889_v57 }
 0xae6   : > { %v902_v8 = vor.u32 1.1754944e-38, %v901_v1  ;;  %vm900_vm8 = vcmp.eq.f32.partialorder %v899_v3, 8.507059e+37 }
 0xaea   : > { %v1684_v58 = vpop.eup %1683 }
 0xaeb   : > { %v891_v59 = vmul.f32 %v1684_v58, %v889_v57  ;;  %vm896_vm5 = vweird.f32 %v1684_v58 }
 0xaec   : > { %vm897_vm7 = vmor %vm895_vm6, %vm896_vm5 }
 0xaed   : > { %v892_v60 = vsub.f32 1.0, %v891_v59 }
 0xaef   : > { %v893_v61 = vmul.f32 %v1684_v58, %v892_v60 }
 0xaf1   : > { %v894_v7 = vadd.f32 %v1684_v58, %v893_v61 }
 0xaf3   : > { %v898_v62 = vsel %vm897_vm7, %v1684_v58, %v894_v7 }
 0xaf4   : > { %v903_v63 = vsel %vm900_vm8, %v902_v8, %v898_v62 }
 0xaf5   : > { %v905_v0 = vmul.f32 %v903_v63, %v842_v49  ;;  %v928_v16 = vsub.f32 1.0, %v903_v63  ;;  %v1042_v49 = vpack.c.bf16 %v1479_v48, %v1479_v48 }
 0xaf7   : > { %v906_v5 = vpack.c.bf16 %v905_v0, %v905_v0  ;;  %v929_v18 = vmul.f32 %v928_v16, %v839_v45 }
 0xaf9   : > { %1471 = vmatmul.msk.bf16.vlgmr.msrb.gmra.mxu0 %vm465_vm1, %v906_v5 }
 0xafa   : > { %1169 = vmatpush.bf16.msrb.mxu0 %v2239_v2 }
 0xafe   : > { %1170 = vmatpush.bf16.msrb.mxu0 %v2245_v4  ;;  %v1473_v4 = vld [vmem:[%s2214_s19 + $0x28] sm:$0xff] }
 0xaff   : > { %v945_v21 = vpack.c.bf16 %v1473_v4, %v1473_v4 }
 0xb01   : > { %1474 = vmatmul.msk.bf16.vlgmr.msrb.gmra.mxu3 %vm435_vm2, %v945_v21 }
 0xb02   : > { %1207 = vmatpush.bf16.msrb.mxu3 %v2276_v11 }
 0xb06   : > { %1208 = vmatpush.bf16.msrb.mxu3 %v2279_v13 }
 0xb09   : > { %1480 = vmatmul.msk.bf16.vlgmr.msra.gmra.mxu0 %vm435_vm2, %v1042_v49 }
 0xb76   : > { %v919_v6 = vpop.f32.mrf.mxu0 }
 0xb77   : > { %924 = vrot.lane.b32.xlu2 %v919_v6, %s1999_s4 }
 0xb7e   : > { %v921_v9 = vpop.f32.mrf.mxu0 }
 0xb84   : > { %v958_v24 = vpop.f32.mrf.mxu3 }
 0xb85   : > { %v959_v26 = vadd.f32 %v2285_v14, %v958_v24 }
 0xb86   : > { %v1055_v57 = vpop.f32.mrf.mxu0 }
 0xb87   : > { %v1056_v60 = vadd.f32 %v2285_v14, %v1055_v57 }
 0xb8c   : > { %v960_v25 = vpop.f32.mrf.mxu3 }
 0xb8e   : > { %v1057_v58 = vpop.f32.mrf.mxu0 }
 0xbd1   : > { %v925_v10 = vpop.permute.xlu2 %924 }
 0xbd2   : > { %v927_v12 = vadd.f32 %v925_v10, %v862_v51 }
 0xbd4   : > { %1685 = vtanh.f32 %v927_v12 }
 0xbda   : > { %v1686_v15 = vpop.eup %1685 }
 0xbdb   : > { %932 = vrot.lane.b32.xlu0 %v1686_v15, %s2001_s9 }
 0xc4d   : > { %v933_v17 = vpop.permute.xlu0 %932 }
 0xc4e   : > { %v935_v19 = vmul.f32 %v933_v17, %v903_v63 }
 0xc50   : > { %v936_v20 = vadd.f32 %v935_v19, %v929_v18 }
 0xc52   : > { %938 = vrot.lane.b32.xlu2 %v936_v20, %s2001_s9  ;;  %v962_v2 = vpack.c.bf16 %v936_v20, %v936_v20 }
 0xc54   : > { %964 = vrot.lane.b32.xlu1 %v962_v2, %s2001_s9 }
 0xcac   : > { %v939_v22 = vpop.permute.xlu2 %938 }
 0xcad   : > { %1472 = vst.msk [vmem:[%s2234_s10 + $0x20] sm:$0xff] %vm465_vm1, %v939_v22 }
 0xcc6   : > { %v965_v23 = vpop.permute.xlu1 %964 }
 0xcc7   : > { %1475 = vmatmul.msk.bf16.vlgmr.msra.gmra.mxu1 %vm465_vm1, %v965_v23  ;;  %v1485_v23 = vld [vmem:[%s2214_s19 + $0x38] sm:$0xff] }
 0xcc8   : > { %v1139_v24 = vpack.c.bf16 %v1485_v23, %v1485_v23 }
 0xd44   : > { %v978_v27 = vpop.f32.mrf.mxu1 }
 0xd45   : > { %v982_v28 = vadd.f32 %v978_v27, %v959_v26 }
 0xd47   : > { %v1476_v29 = vmul.f32 -1.442695, %v982_v28 }
 0xd49   : > { %1687 = vpow2.f32 %v1476_v29 }
 0xd4c   : > { %v980_v30 = vpop.f32.mrf.mxu1 }
 0xd4f   : > { %v1688_v31 = vpop.eup %1687 }
 0xd50   : > { %v986_v32 = vadd.f32 1.0, %v1688_v31 }
 0xd52   : > { %1689 = vrcp.f32 %v986_v32  ;;  %v998_v34 = vand.u32 2147483648, %v986_v32  ;;  %v996_v36 = vand.u32 2147483647, %v986_v32  ;;  %vm992_vm10 = vweird.f32 %v986_v32 }
 0xd54   : > { %v999_v38 = vor.u32 1.1754944e-38, %v998_v34  ;;  %vm997_vm12 = vcmp.eq.f32.partialorder %v996_v36, 8.507059e+37 }
 0xd58   : > { %v1690_v11 = vpop.eup %1689 }
 0xd59   : > { %v988_v13 = vmul.f32 %v1690_v11, %v986_v32  ;;  %vm993_vm9 = vweird.f32 %v1690_v11 }
 0xd5a   : > { %vm994_vm11 = vmor %vm992_vm10, %vm993_vm9 }
 0xd5b   : > { %v989_v33 = vsub.f32 1.0, %v988_v13 }
 0xd5d   : > { %v990_v35 = vmul.f32 %v1690_v11, %v989_v33 }
 0xd5f   : > { %v991_v37 = vadd.f32 %v1690_v11, %v990_v35 }
 0xd61   : > { %v995_v39 = vsel %vm994_vm11, %v1690_v11, %v991_v37 }
 0xd62   : > { %v1000_v40 = vsel %vm997_vm12, %v999_v38, %v995_v39 }
 0xd63   : > { %v1002_v41 = vmul.f32 %v1000_v40, %v939_v22  ;;  %v1025_v50 = vsub.f32 1.0, %v1000_v40 }
 0xd65   : > { %v1003_v42 = vpack.c.bf16 %v1002_v41, %v1002_v41  ;;  %v1026_v52 = vmul.f32 %v1025_v50, %v936_v20 }
 0xd67   : > { %1477 = vmatmul.msk.bf16.vlgmr.msra.gmra.mxu2 %vm465_vm1, %v1003_v42 }
 0xd77   : > { %1486 = vmatmul.msk.bf16.vlgmr.msrb.gmra.mxu2 %vm435_vm2, %v1139_v24 }
 0xdea   : > { %v1016_v43 = vpop.f32.mrf.mxu2 }
 0xdeb   : > { %1021 = vrot.lane.b32.xlu0 %v1016_v43, %s1999_s4 }
 0xdf2   : > { %v1018_v44 = vpop.f32.mrf.mxu2 }
 0xdfa   : > { %v1152_v31 = vpop.f32.mrf.mxu2 }
 0xdfb   : > { %v1153_v33 = vadd.f32 %v2285_v14, %v1152_v31 }
 0xe02   : > { %v1154_v32 = vpop.f32.mrf.mxu2 }
 0xe5d   : > { %v1022_v45 = vpop.permute.xlu0 %1021 }
 0xe5e   : > { %v1024_v46 = vadd.f32 %v1022_v45, %v959_v26 }
 0xe60   : > { %1691 = vtanh.f32 %v1024_v46 }
 0xe66   : > { %v1692_v47 = vpop.eup %1691 }
 0xe67   : > { %1029 = vrot.lane.b32.xlu1 %v1692_v47, %s2001_s9 }
 0xed9   : > { %v1030_v51 = vpop.permute.xlu1 %1029 }
 0xeda   : > { %v1032_v53 = vmul.f32 %v1030_v51, %v1000_v40 }
 0xedc   : > { %v1033_v54 = vadd.f32 %v1032_v53, %v1026_v52 }
 0xede   : > { %1035 = vrot.lane.b32.xlu0 %v1033_v54, %s2001_s9  ;;  %v1059_v55 = vpack.c.bf16 %v1033_v54, %v1033_v54 }
 0xee0   : > { %1061 = vrot.lane.b32.xlu2 %v1059_v55, %s2001_s9 }
 0xf3a   : > { %v1062_v56 = vpop.permute.xlu2 %1061 }
 0xf3b   : > { %1481 = vmatmul.msk.bf16.vlgmr.msra.gmra.mxu3 %vm465_vm1, %v1062_v56 }
 0xf50   : > { %v1036_v59 = vpop.permute.xlu0 %1035 }
 0xf51   : > { %1478 = vst.msk [vmem:[%s2234_s10 + $0x28] sm:$0xff] %vm465_vm1, %v1036_v59 }
 0xfbe   : > { %v1075_v1 = vpop.f32.mrf.mxu3 }
 0xfbf   : > { %v1079_v61 = vadd.f32 %v1075_v1, %v1056_v60 }
 0xfc1   : > { %v1482_v3 = vmul.f32 -1.442695, %v1079_v61 }
 0xfc3   : > { %1693 = vpow2.f32 %v1482_v3 }
 0xfc6   : > { %v1077_v7 = vpop.f32.mrf.mxu3 }
 0xfc9   : > { %v1694_v8 = vpop.eup %1693 }
 0xfca   : > { %v1083_v62 = vadd.f32 1.0, %v1694_v8 }
 0xfcc   : > { %1695 = vrcp.f32 %v1083_v62  ;;  %v1095_v6 = vand.u32 2147483648, %v1083_v62  ;;  %v1093_v10 = vand.u32 2147483647, %v1083_v62  ;;  %vm1089_vm14 = vweird.f32 %v1083_v62 }
 0xfce   : > { %v1096_v15 = vor.u32 1.1754944e-38, %v1095_v6  ;;  %vm1094_vm0 = vcmp.eq.f32.partialorder %v1093_v10, 8.507059e+37 }
 0xfd2   : > { %v1696_v63 = vpop.eup %1695 }
 0xfd3   : > { %v1085_v0 = vmul.f32 %v1696_v63, %v1083_v62  ;;  %vm1090_vm13 = vweird.f32 %v1696_v63 }
 0xfd4   : > { %vm1091_vm15 = vmor %vm1089_vm14, %vm1090_vm13 }
 0xfd5   : > { %v1086_v5 = vsub.f32 1.0, %v1085_v0 }
 0xfd7   : > { %v1087_v9 = vmul.f32 %v1696_v63, %v1086_v5 }
 0xfd9   : > { %v1088_v12 = vadd.f32 %v1696_v63, %v1087_v9 }
 0xfdb   : > { %v1092_v16 = vsel %vm1091_vm15, %v1696_v63, %v1088_v12 }
 0xfdc   : > { %v1097_v17 = vsel %vm1094_vm0, %v1096_v15, %v1092_v16 }
 0xfdd   : > { %v1099_v18 = vmul.f32 %v1097_v17, %v1036_v59  ;;  %v1122_v25 = vsub.f32 1.0, %v1097_v17 }
 0xfdf   : > { %v1100_v19 = vpack.c.bf16 %v1099_v18, %v1099_v18  ;;  %v1123_v27 = vmul.f32 %v1122_v25, %v1033_v54 }
 0xfe1   : > { %1483 = vmatmul.msk.bf16.vlgmr.msrb.gmra.mxu1 %vm465_vm1, %v1100_v19 }
0x105e   : > { %v1113_v20 = vpop.f32.mrf.mxu1 }
0x105f   : > { %1118 = vrot.lane.b32.xlu1 %v1113_v20, %s1999_s4 }
0x1066   : > { %v1115_v2 = vpop.f32.mrf.mxu1 }
0x10d1   : > { %v1119_v4 = vpop.permute.xlu1 %1118 }
0x10d2   : > { %v1121_v21 = vadd.f32 %v1119_v4, %v1056_v60 }
0x10d4   : > { %1697 = vtanh.f32 %v1121_v21 }
0x10da   : > { %v1698_v22 = vpop.eup %1697 }
0x10db   : > { %1126 = vrot.lane.b32.xlu2 %v1698_v22, %s2001_s9 }
0x1135   : > { %v1127_v26 = vpop.permute.xlu2 %1126 }
0x1136   : > { %v1129_v28 = vmul.f32 %v1127_v26, %v1097_v17 }
0x1138   : > { %v1130_v29 = vadd.f32 %v1129_v28, %v1123_v27 }
0x113a   : > { %1132 = vrot.lane.b32.xlu1 %v1130_v29, %s2001_s9  ;;  %v1156_v30 = vpack.c.bf16 %v1130_v29, %v1130_v29 }
0x113c   : > { %1158 = vrot.lane.b32.xlu0 %v1156_v30, %s2001_s9 }
0x11ac   : > { %v1133_v11 = vpop.permute.xlu1 %1132 }
0x11ad   : > { %1484 = vst.msk [vmem:[%s2234_s10 + $0x30] sm:$0xff] %vm465_vm1, %v1133_v11 }
0x11ae   : > { %v1159_v13 = vpop.permute.xlu0 %1158 }
0x11af   : > { %1487 = vmatmul.msk.bf16.vlgmr.msrb.gmra.mxu0 %vm465_vm1, %v1159_v13 }
0x122c   : > { %v1172_v34 = vpop.f32.mrf.mxu0 }
0x122d   : > { %v1176_v35 = vadd.f32 %v1172_v34, %v1153_v33 }
0x122f   : > { %v1488_v36 = vmul.f32 -1.442695, %v1176_v35 }
0x1231   : > { %1699 = vpow2.f32 %v1488_v36 }
0x1234   : > { %v1174_v37 = vpop.f32.mrf.mxu0 }
0x1237   : > { %v1700_v38 = vpop.eup %1699 }
0x1238   : > { %v1180_v39 = vadd.f32 1.0, %v1700_v38 }
0x123a   : > { %1701 = vrcp.f32 %v1180_v39  ;;  %v1192_v43 = vand.u32 2147483648, %v1180_v39  ;;  %v1190_v45 = vand.u32 2147483647, %v1180_v39  ;;  %vm1186_vm3 = vweird.f32 %v1180_v39 }
0x123c   : > { %v1193_v47 = vor.u32 1.1754944e-38, %v1192_v43  ;;  %vm1191_vm5 = vcmp.eq.f32.partialorder %v1190_v45, 8.507059e+37 }
0x1240   : > { %v1702_v40 = vpop.eup %1701 }
0x1241   : > { %v1182_v41 = vmul.f32 %v1702_v40, %v1180_v39  ;;  %vm1187_vm2 = vweird.f32 %v1702_v40 }
0x1242   : > { %vm1188_vm4 = vmor %vm1186_vm3, %vm1187_vm2 }
0x1243   : > { %v1183_v42 = vsub.f32 1.0, %v1182_v41 }
0x1245   : > { %v1184_v44 = vmul.f32 %v1702_v40, %v1183_v42 }
0x1247   : > { %v1185_v46 = vadd.f32 %v1702_v40, %v1184_v44 }
0x1249   : > { %v1189_v14 = vsel %vm1188_vm4, %v1702_v40, %v1185_v46 }
0x124a   : > { %v1194_v48 = vsel %vm1191_vm5, %v1193_v47, %v1189_v14 }
0x124b   : > { %v1196_v49 = vmul.f32 %v1194_v48, %v1133_v11  ;;  %v1219_v56 = vsub.f32 1.0, %v1194_v48 }
0x124d   : > { %v1197_v50 = vpack.c.bf16 %v1196_v49, %v1196_v49  ;;  %v1220_v58 = vmul.f32 %v1219_v56, %v1130_v29 }
0x124f   : > { %1489 = vmatmul.msk.bf16.vlgmr.msrb.gmra.mxu3 %vm465_vm1, %v1197_v50 }
0x12d2   : > { %v1210_v51 = vpop.f32.mrf.mxu3 }
0x12d3   : > { %1215 = vrot.lane.b32.xlu2 %v1210_v51, %s1999_s4  ;;  %s1875_s4 = scalar_lea.hbm %s2506_s15, 256 }
0x12d4   : > { %p1877_p9 = scmp.lt.s32.totalorder %s1875_s4, %s1871_s27 }
0x12d6   : > { %p1878_p10 = por %p1877_p9, %p1876_p2 }
0x12d8   : > { %p1879_p11 = pnand %p1878_p10, %p1874_p7 }
0x12da   : > { %v1212_v52 = vpop.f32.mrf.mxu3 }
0x132d   : > { %v1216_v53 = vpop.permute.xlu2 %1215 }
0x132e   : > { %v1218_v54 = vadd.f32 %v1216_v53, %v1153_v33 }
0x1330   : > { %1703 = vtanh.f32 %v1218_v54 }
0x1336   : > { %v1704_v55 = vpop.eup %1703 }
0x1337   : > { %1223 = vrot.lane.b32.xlu0 %v1704_v55, %s2001_s9 }
0x13a9   : > { %v1224_v57 = vpop.permute.xlu0 %1223 }
0x13aa   : > { %v1226_v59 = vmul.f32 %v1224_v57, %v1194_v48 }
0x13ac   : > { %v1227_v60 = vadd.f32 %v1226_v59, %v1220_v58 }
0x13ae   : > { %1229 = vrot.lane.b32.xlu1 %v1227_v60, %s2001_s9 }
0x1420   : > { %v1230_v1 = vpop.permute.xlu1 %1229 }
0x1421   : > { %1490 = vst.msk [vmem:[%s2234_s10 + $0x38] sm:$0xff] %vm465_vm1, %v1230_v1 }
0x1422   : > { %1234 = vst.msk [vmem:[#allocation2] sm:$0xff] %vm465_vm1, %v1230_v1 }
0x1423   : > { %1882 = shalt.err (!%p1879_p11)
}
0x1424   : > { %s2002_s16 = smov 128   ;;  %s2003_s10 = smov 256  }
0x1425   : > { %s2004_s13 = smov 8  }
0x1426   : > { %1523 = dma.vmem_to_hbm [thread:$0]  (%p2155_p3), %s1251_s3, 1024, %s1253_s18, %s1236_s2, %s2002_s16, %s2003_s10, %s2004_s13  }
0x1427 PF: > { %s2507_s11 = sld [smem:[#allocation18_spill]]  ;;  %p1553_p12 = scmp.ge.s32.totalorder %s1989_s7, 2 }
0x1429   : > { %p1543_p0 = pnand %p1553_p12, %p2110_p6 }
0x142b   : > { %p1544_p5 = pneg %p1543_p0 }
0x142d   : > { %s1267_s20 = sand.u32 1, %s2507_s11  }
0x142e   : > { %s1268_s19 = scalar_lea.sflag [#allocation5], %s1267_s20 }
0x142f   : > { %1944 = dma.done.wait (%p1544_p5), %s1268_s19, 1024  }
0x1430   : > { %1946 = vsyncadd (%p1544_p5), %s1268_s19, 4294966272  ;;  %s26_s7 = sadd.s32 1, %s1989_s7   ;;  %s2509_s27 = sld [smem:[#allocation19_spill]] }
0x1431   : > { %p23_p13 = scmp.ge.s32.totalorder %s26_s7, 6   ;;  %s2510_s17 = sld [smem:[#allocation21_spill]] }
0x1432   : > { %s2511_s3 = smov %s2526_s24  ;;  %s2512_s21 = smov %s1953_s22 }
0x1433   : > { %s2513_s22 = smov %s1957_s23  ;;  %s2514_s23 = smov %s2189_s29 }
0x1434   : > { %s2515_s24 = smov %s1965_s25  ;;  %s2516_s25 = smov %s1969_s26 }
0x1435   : > { %s2517_s26 = smov %s2174_s14  ;;  %s2518_s28 = smov %s1985_s30 }
0x1436   : > { %s2520_s30 = smov %s2511_s3  ;;  %25 = sbr.rel (!%p23_p13) target bundleno = 18 (0x12), region = 132 }
0x1437   : > { %s2519_s29 = smov %s2510_s17 }
0x143b   :  { %1274 = vsyncpa [#allocation4], 1 }
0x143c   :  { %1276 = vsyncpa [#allocation4 + $0x1], 1 }
0x143d   :  { %1277 = vsyncpa [#allocation7], 1 }
0x143e   :  { %1279 = vsyncpa [#allocation7 + $0x1], 1 }
0x143f   :  { %1280 = vsyncpa [#allocation10], 1 }
0x1440   :  { %1281 = vsyncpa [#allocation5], 1 }
0x1441   :  { %1283 = vsyncpa [#allocation5 + $0x1], 1 }

</bundles_post_ra>
